<compile_context>
chip_gen: v7x
topology: tpu7x:2x2x1
jax: 0.10.0
libtpu: 0.0.40
codegen_flags: <defaults>
</compile_context>

<pallas_src>
import numpy as np
import jax
import jax.numpy as jnp
from jax.experimental import pallas as pl
from jax.experimental.pallas import tpu as pltpu


def _dft_matrices(n, dtype=jnp.float32):
    """Real/imag parts of the ortho-normalized *forward* DFT matrix.

    The ortho inverse DFT matrix is exactly the complex conjugate, so the
    inverse pass reuses these matrices with a sign flip (conjugate reuse).
    """
    idx = np.arange(n)
    ang = 2.0 * np.pi * np.outer(idx, idx) / n
    scale = 1.0 / np.sqrt(n)
    fr = (np.cos(ang) * scale).astype(np.float32)
    fi = (-np.sin(ang) * scale).astype(np.float32)
    return jnp.asarray(fr, dtype), jnp.asarray(fi, dtype)


def _cmatmul(ar, ai, br, bi, conj_a=False, conj_b=False, a_sum=None, b_sum=None):
    """Karatsuba (3-matmul) complex matmul on the MXU with f32 accumulation.

    Computes (ar + i*ai) @ (br + i*bi); `conj_a` / `conj_b` conjugate the
    corresponding operand.  `a_sum` / `b_sum` let callers hoist the
    (ar +/- ai)-style elementwise adds out of loops.
    """
    t1 = jnp.dot(ar, br, preferred_element_type=jnp.float32)
    t2 = jnp.dot(ai, bi, preferred_element_type=jnp.float32)
    if a_sum is None:
        a_sum = ar - ai if conj_a else ar + ai
    if b_sum is None:
        b_sum = br - bi if conj_b else br + bi
    t3 = jnp.dot(a_sum, b_sum, preferred_element_type=jnp.float32)
    if conj_a != conj_b:
        return t1 + t2, t3 - t1 + t2
    return t1 - t2, t3 - t1 - t2


def _make_dc_kernel(B, H, W):
    def _dc_kernel(im_ref, k0_ref, mask_ref,
                   fhr_ref, fhi_ref, fwr_ref, fwi_ref, out_ref):
        fhr = fhr_ref[...]
        fhi = fhi_ref[...]
        fwr = fwr_ref[...]
        fwi = fwi_ref[...]

        im = im_ref[...]        # (B, 2, H, W)
        k0 = k0_ref[...]        # (B, 2, H, W)
        mask = mask_ref[...]    # (B, 1, H, W)

        # ---- forward DFT along W: batch + rows folded into the matmul M dim
        xr = im[:, 0].reshape(B * H, W)
        xi = im[:, 1].reshape(B * H, W)
        yr, yi = _cmatmul(xr, xi, fwr, fwi)               # (B*H, W)
        yr = yr.reshape(B, H, W)
        yi = yi.reshape(B, H, W)

        # hoisted Karatsuba operand sums for the H-axis matrices
        fh_plus = fhr + fhi      # forward:       F_H @ Y
        fh_minus = fhr - fhi     # inverse:  conj(F_H) @ K_dc

        bmr_rows = []
        bmi_rows = []
        for b in range(B):
            # forward DFT along H:  K = F_H @ Y
            kr, ki = _cmatmul(fhr, fhi, yr[b], yi[b], a_sum=fh_plus)

            # k-space data consistency:  K_dc = K + m * (K0 - K)
            m = mask[b, 0]
            kdr = kr + m * (k0[b, 0] - kr)
            kdi = ki + m * (k0[b, 1] - ki)

            # inverse DFT along H:  conj(F_H) @ K_dc  (ortho IDFT == conj DFT)
            bmr, bmi = _cmatmul(fhr, fhi, kdr, kdi, conj_a=True, a_sum=fh_minus)
            bmr_rows.append(bmr)
            bmi_rows.append(bmi)

        if B == 1:
            bmr_all, bmi_all = bmr_rows[0], bmi_rows[0]
        else:
            bmr_all = jnp.concatenate(bmr_rows, axis=0)
            bmi_all = jnp.concatenate(bmi_rows, axis=0)

        # ---- inverse DFT along W:  Out = (conj(F_H) @ K_dc) @ conj(F_W)
        outr, outi = _cmatmul(bmr_all, bmi_all, fwr, fwi, conj_b=True)  # (B*H, W)
        outr = outr.reshape(B, H, W).astype(out_ref.dtype)
        outi = outi.reshape(B, H, W).astype(out_ref.dtype)
        for b in range(B):
            out_ref[b, 0] = outr[b]
            out_ref[b, 1] = outi[b]

    return _dc_kernel


def _pick_batch_block(N, H, W):
    """Images per grid step.

    Goals: (a) B*H rows fill the MXU M dim for the W-axis matmuls,
    (b) keep >= 2 grid steps so the parallel batch axis can shard across
    TensorCores (v7x has 2), (c) stay within ~24 MiB of VMEM: pipelined I/O
    blocks are double-buffered (7 f32 planes/image) plus ~14 live f32
    intermediates in the kernel body.
    """
    per_image_bytes = (2 * 7 + 14) * H * W * 4
    budget = 24 * 1024 * 1024
    best = 1
    for cand in range(1, N + 1):
        if N % cand:
            continue
        if cand * per_image_bytes > budget:
            break
        if N >= 2 and N // cand < 2:
            break
        best = cand
        if cand * H >= 256:     # MXU M dim already well filled
            break
    return best


def data_consistency(im_recon, k0, mask):
    """im_recon, k0: (N, 2, H, W) float32; mask: (N, 1, H, W) float32."""
    N, C, H, W = im_recon.shape
    assert C == 2, "pseudo-complex input expected (channel 0 = real, 1 = imag)"

    B = _pick_batch_block(N, H, W)
    grid = N // B

    fhr, fhi = _dft_matrices(H)
    fwr, fwi = _dft_matrices(W)

    # Advisory cost hint (Karatsuba: 12 real matmuls per image).
    flops = int(N) * 12 * int(H) * int(W) * (int(H) + int(W))
    bytes_accessed = 4 * (int(N) * int(H) * int(W) * (2 + 2 + 1 + 2)
                          + 2 * (int(H) * int(H) + int(W) * int(W)))
    cost = pl.CostEstimate(flops=flops, transcendentals=0,
                           bytes_accessed=bytes_accessed)

    kernel = _make_dc_kernel(B, H, W)

    def build(single_buffer_mats):
        mat_kwargs = {}
        if single_buffer_mats and hasattr(pl, "Buffered"):
            # Constant index_map across the grid -> double-buffering the DFT
            # matrices is pure VMEM waste; request a single buffer.
            mat_kwargs = dict(pipeline_mode=pl.Buffered(1))
        img_spec = pl.BlockSpec((B, 2, H, W), lambda g: (g, 0, 0, 0))
        mask_spec = pl.BlockSpec((B, 1, H, W), lambda g: (g, 0, 0, 0))
        mat_h_spec = pl.BlockSpec((H, H), lambda g: (0, 0), **mat_kwargs)
        mat_w_spec = pl.BlockSpec((W, W), lambda g: (0, 0), **mat_kwargs)
        return pl.pallas_call(
            kernel,
            out_shape=jax.ShapeDtypeStruct((N, 2, H, W), im_recon.dtype),
            grid_spec=pltpu.PrefetchScalarGridSpec(
                num_scalar_prefetch=0,
                grid=(grid,),
                in_specs=[
                    img_spec,                 # im_recon
                    img_spec,                 # k0 (pseudo-complex)
                    mask_spec,                # mask
                    mat_h_spec, mat_h_spec,   # forward DFT over H (re, im)
                    mat_w_spec, mat_w_spec,   # forward DFT over W (re, im)
                ],
                out_specs=img_spec,
            ),
            compiler_params=pltpu.CompilerParams(
                dimension_semantics=("parallel",),
                vmem_limit_bytes=64 * 1024 * 1024),
            cost_estimate=cost,
        )

    args = (im_recon, k0, mask, fhr, fhi, fwr, fwi)
    try:
        return build(True)(*args)
    except Exception:
        # Fallback if this JAX build rejects single-buffered pipeline_mode.
        return build(False)(*args)


def _reference(im_recon, k0, mask):
    """Pure-JAX reference of the same semantics (fft2/ifft2, norm='ortho')."""
    im_c = im_recon[:, 0] + 1j * im_recon[:, 1]
    k0_c = k0[:, 0] + 1j * k0[:, 1]
    k = jnp.fft.fft2(im_c, norm="ortho")
    m = mask[:, 0]
    k_dc = (1.0 - m) * k + m * k0_c
    im_dc = jnp.fft.ifft2(k_dc, norm="ortho")
    return jnp.stack([jnp.real(im_dc), jnp.imag(im_dc)], axis=1).astype(im_recon.dtype)


if __name__ == "__main__":
    key = jax.random.PRNGKey(0)
    k1, k2, k3 = jax.random.split(key, 3)

    N, H, W = 2, 16, 16
    im_recon = jax.random.normal(k1, (N, 2, H, W), dtype=jnp.float32)
    k0 = jax.random.normal(k2, (N, 2, H, W), dtype=jnp.float32)
    mask = (jax.random.uniform(k3, (N, 1, H, W)) > 0.5).astype(jnp.float32)

    out = data_consistency(im_recon, k0, mask)
    out = jax.block_until_ready(out)

    ref = jax.block_until_ready(_reference(im_recon, k0, mask))
    np.testing.assert_allclose(np.asarray(out), np.asarray(ref), rtol=1e-4, atol=1e-4)

    print("KERNEL_OK")
</pallas_src>

<mosaic_0001>
module attributes {stable_mosaic.version = 11 : i64} {
  func.func @_dc_kernel(%arg0: i32, %arg1: memref<1x2x16x16xf32, #tpu.memory_space<vmem>>, %arg2: memref<1x2x16x16xf32, #tpu.memory_space<vmem>>, %arg3: memref<1x1x16x16xf32, #tpu.memory_space<vmem>>, %arg4: memref<16x16xf32, #tpu.memory_space<vmem>>, %arg5: memref<16x16xf32, #tpu.memory_space<vmem>>, %arg6: memref<16x16xf32, #tpu.memory_space<vmem>>, %arg7: memref<16x16xf32, #tpu.memory_space<vmem>>, %arg8: memref<1x2x16x16xf32, #tpu.memory_space<vmem>>) attributes {dimension_semantics = [#tpu.dimension_semantics<parallel>], iteration_bounds = array<i64: 2>, scalar_prefetch = 0 : i64, scratch_operands = 0 : i64, tpu.core_type = #tpu.core_type<tc>, window_params = [{transform_indices = @transform_0, window_bounds = array<i64: 1, 2, 16, 16>}, {transform_indices = @transform_1, window_bounds = array<i64: 1, 2, 16, 16>}, {transform_indices = @transform_2, window_bounds = array<i64: 1, 1, 16, 16>}, {pipeline_mode = #tpu.pipeline_mode<synchronous>, transform_indices = @transform_3, window_bounds = array<i64: 16, 16>}, {pipeline_mode = #tpu.pipeline_mode<synchronous>, transform_indices = @transform_4, window_bounds = array<i64: 16, 16>}, {pipeline_mode = #tpu.pipeline_mode<synchronous>, transform_indices = @transform_5, window_bounds = array<i64: 16, 16>}, {pipeline_mode = #tpu.pipeline_mode<synchronous>, transform_indices = @transform_6, window_bounds = array<i64: 16, 16>}, {transform_indices = @transform_7, window_bounds = array<i64: 1, 2, 16, 16>}]} {
    %c0 = arith.constant 0 : index
    %c0_0 = arith.constant 0 : index
    %0 = vector.load %arg4[%c0, %c0_0] : memref<16x16xf32, #tpu.memory_space<vmem>>, vector<16x16xf32>
    %c0_1 = arith.constant 0 : index
    %c0_2 = arith.constant 0 : index
    %1 = vector.load %arg5[%c0_1, %c0_2] : memref<16x16xf32, #tpu.memory_space<vmem>>, vector<16x16xf32>
    %c0_3 = arith.constant 0 : index
    %c0_4 = arith.constant 0 : index
    %2 = vector.load %arg6[%c0_3, %c0_4] : memref<16x16xf32, #tpu.memory_space<vmem>>, vector<16x16xf32>
    %c0_5 = arith.constant 0 : index
    %c0_6 = arith.constant 0 : index
    %3 = vector.load %arg7[%c0_5, %c0_6] : memref<16x16xf32, #tpu.memory_space<vmem>>, vector<16x16xf32>
    %c0_7 = arith.constant 0 : index
    %c0_8 = arith.constant 0 : index
    %c0_9 = arith.constant 0 : index
    %c0_10 = arith.constant 0 : index
    %4 = vector.load %arg1[%c0_7, %c0_8, %c0_9, %c0_10] : memref<1x2x16x16xf32, #tpu.memory_space<vmem>>, vector<1x2x16x16xf32>
    %c0_11 = arith.constant 0 : index
    %c0_12 = arith.constant 0 : index
    %c0_13 = arith.constant 0 : index
    %c0_14 = arith.constant 0 : index
    %5 = vector.load %arg2[%c0_11, %c0_12, %c0_13, %c0_14] : memref<1x2x16x16xf32, #tpu.memory_space<vmem>>, vector<1x2x16x16xf32>
    %c0_15 = arith.constant 0 : index
    %c0_16 = arith.constant 0 : index
    %c0_17 = arith.constant 0 : index
    %c0_18 = arith.constant 0 : index
    %6 = vector.load %arg3[%c0_15, %c0_16, %c0_17, %c0_18] : memref<1x1x16x16xf32, #tpu.memory_space<vmem>>, vector<1x1x16x16xf32>
    %7 = vector.extract_strided_slice %4 {offsets = [0, 0, 0, 0], sizes = [1, 1, 16, 16], strides = [1, 1, 1, 1]} : vector<1x2x16x16xf32> to vector<1x1x16x16xf32>
    %8 = vector.shape_cast %7 : vector<1x1x16x16xf32> to vector<1x16x16xf32>
    %9 = vector.shape_cast %8 : vector<1x16x16xf32> to vector<16x16xf32>
    %10 = vector.extract_strided_slice %4 {offsets = [0, 1, 0, 0], sizes = [1, 1, 16, 16], strides = [1, 1, 1, 1]} : vector<1x2x16x16xf32> to vector<1x1x16x16xf32>
    %11 = vector.shape_cast %10 : vector<1x1x16x16xf32> to vector<1x16x16xf32>
    %12 = vector.shape_cast %11 : vector<1x16x16xf32> to vector<16x16xf32>
    %cst = arith.constant dense<0.000000e+00> : vector<16x16xf32>
    %13 = tpu.matmul %9, %2, %cst {dimension_numbers = #tpu.dot_dimension_numbers<[1], [0], [0], [1], [0, 0, 1, 1], [], []>} : vector<16x16xf32>, vector<16x16xf32>, vector<16x16xf32> -> vector<16x16xf32>
    %cst_19 = arith.constant dense<0.000000e+00> : vector<16x16xf32>
    %14 = tpu.matmul %12, %3, %cst_19 {dimension_numbers = #tpu.dot_dimension_numbers<[1], [0], [0], [1], [0, 0, 1, 1], [], []>} : vector<16x16xf32>, vector<16x16xf32>, vector<16x16xf32> -> vector<16x16xf32>
    %15 = arith.addf %9, %12 : vector<16x16xf32>
    %16 = arith.addf %2, %3 : vector<16x16xf32>
    %cst_20 = arith.constant dense<0.000000e+00> : vector<16x16xf32>
    %17 = tpu.matmul %15, %16, %cst_20 {dimension_numbers = #tpu.dot_dimension_numbers<[1], [0], [0], [1], [0, 0, 1, 1], [], []>} : vector<16x16xf32>, vector<16x16xf32>, vector<16x16xf32> -> vector<16x16xf32>
    %18 = arith.subf %13, %14 : vector<16x16xf32>
    %19 = arith.subf %17, %13 : vector<16x16xf32>
    %20 = arith.subf %19, %14 : vector<16x16xf32>
    %21 = vector.shape_cast %18 : vector<16x16xf32> to vector<1x16x16xf32>
    %22 = vector.shape_cast %20 : vector<16x16xf32> to vector<1x16x16xf32>
    %23 = arith.addf %0, %1 : vector<16x16xf32>
    %24 = arith.subf %0, %1 : vector<16x16xf32>
    %25 = vector.shape_cast %21 : vector<1x16x16xf32> to vector<16x16xf32>
    %26 = vector.shape_cast %22 : vector<1x16x16xf32> to vector<16x16xf32>
    %cst_21 = arith.constant dense<0.000000e+00> : vector<16x16xf32>
    %27 = tpu.matmul %0, %25, %cst_21 {dimension_numbers = #tpu.dot_dimension_numbers<[1], [0], [0], [1], [0, 0, 1, 1], [], []>} : vector<16x16xf32>, vector<16x16xf32>, vector<16x16xf32> -> vector<16x16xf32>
    %cst_22 = arith.constant dense<0.000000e+00> : vector<16x16xf32>
    %28 = tpu.matmul %1, %26, %cst_22 {dimension_numbers = #tpu.dot_dimension_numbers<[1], [0], [0], [1], [0, 0, 1, 1], [], []>} : vector<16x16xf32>, vector<16x16xf32>, vector<16x16xf32> -> vector<16x16xf32>
    %29 = arith.addf %25, %26 : vector<16x16xf32>
    %cst_23 = arith.constant dense<0.000000e+00> : vector<16x16xf32>
    %30 = tpu.matmul %23, %29, %cst_23 {dimension_numbers = #tpu.dot_dimension_numbers<[1], [0], [0], [1], [0, 0, 1, 1], [], []>} : vector<16x16xf32>, vector<16x16xf32>, vector<16x16xf32> -> vector<16x16xf32>
    %31 = arith.subf %27, %28 : vector<16x16xf32>
    %32 = arith.subf %30, %27 : vector<16x16xf32>
    %33 = arith.subf %32, %28 : vector<16x16xf32>
    %34 = vector.shape_cast %6 : vector<1x1x16x16xf32> to vector<16x16xf32>
    %35 = vector.extract_strided_slice %5 {offsets = [0, 0, 0, 0], sizes = [1, 1, 16, 16], strides = [1, 1, 1, 1]} : vector<1x2x16x16xf32> to vector<1x1x16x16xf32>
    %36 = vector.shape_cast %35 : vector<1x1x16x16xf32> to vector<16x16xf32>
    %37 = arith.subf %36, %31 : vector<16x16xf32>
    %38 = arith.mulf %34, %37 : vector<16x16xf32>
    %39 = arith.addf %31, %38 : vector<16x16xf32>
    %40 = vector.extract_strided_slice %5 {offsets = [0, 1, 0, 0], sizes = [1, 1, 16, 16], strides = [1, 1, 1, 1]} : vector<1x2x16x16xf32> to vector<1x1x16x16xf32>
    %41 = vector.shape_cast %40 : vector<1x1x16x16xf32> to vector<16x16xf32>
    %42 = arith.subf %41, %33 : vector<16x16xf32>
    %43 = arith.mulf %34, %42 : vector<16x16xf32>
    %44 = arith.addf %33, %43 : vector<16x16xf32>
    %cst_24 = arith.constant dense<0.000000e+00> : vector<16x16xf32>
    %45 = tpu.matmul %0, %39, %cst_24 {dimension_numbers = #tpu.dot_dimension_numbers<[1], [0], [0], [1], [0, 0, 1, 1], [], []>} : vector<16x16xf32>, vector<16x16xf32>, vector<16x16xf32> -> vector<16x16xf32>
    %cst_25 = arith.constant dense<0.000000e+00> : vector<16x16xf32>
    %46 = tpu.matmul %1, %44, %cst_25 {dimension_numbers = #tpu.dot_dimension_numbers<[1], [0], [0], [1], [0, 0, 1, 1], [], []>} : vector<16x16xf32>, vector<16x16xf32>, vector<16x16xf32> -> vector<16x16xf32>
    %47 = arith.addf %39, %44 : vector<16x16xf32>
    %cst_26 = arith.constant dense<0.000000e+00> : vector<16x16xf32>
    %48 = tpu.matmul %24, %47, %cst_26 {dimension_numbers = #tpu.dot_dimension_numbers<[1], [0], [0], [1], [0, 0, 1, 1], [], []>} : vector<16x16xf32>, vector<16x16xf32>, vector<16x16xf32> -> vector<16x16xf32>
    %49 = arith.addf %45, %46 : vector<16x16xf32>
    %50 = arith.subf %48, %45 : vector<16x16xf32>
    %51 = arith.addf %50, %46 : vector<16x16xf32>
    %cst_27 = arith.constant dense<0.000000e+00> : vector<16x16xf32>
    %52 = tpu.matmul %49, %2, %cst_27 {dimension_numbers = #tpu.dot_dimension_numbers<[1], [0], [0], [1], [0, 0, 1, 1], [], []>} : vector<16x16xf32>, vector<16x16xf32>, vector<16x16xf32> -> vector<16x16xf32>
    %cst_28 = arith.constant dense<0.000000e+00> : vector<16x16xf32>
    %53 = tpu.matmul %51, %3, %cst_28 {dimension_numbers = #tpu.dot_dimension_numbers<[1], [0], [0], [1], [0, 0, 1, 1], [], []>} : vector<16x16xf32>, vector<16x16xf32>, vector<16x16xf32> -> vector<16x16xf32>
    %54 = arith.addf %49, %51 : vector<16x16xf32>
    %55 = arith.subf %2, %3 : vector<16x16xf32>
    %cst_29 = arith.constant dense<0.000000e+00> : vector<16x16xf32>
    %56 = tpu.matmul %54, %55, %cst_29 {dimension_numbers = #tpu.dot_dimension_numbers<[1], [0], [0], [1], [0, 0, 1, 1], [], []>} : vector<16x16xf32>, vector<16x16xf32>, vector<16x16xf32> -> vector<16x16xf32>
    %57 = arith.addf %52, %53 : vector<16x16xf32>
    %58 = arith.subf %56, %52 : vector<16x16xf32>
    %59 = arith.addf %58, %53 : vector<16x16xf32>
    %60 = vector.shape_cast %57 : vector<16x16xf32> to vector<1x16x16xf32>
    %61 = vector.shape_cast %59 : vector<16x16xf32> to vector<1x16x16xf32>
    %62 = vector.shape_cast %60 : vector<1x16x16xf32> to vector<16x16xf32>
    %c0_30 = arith.constant 0 : index
    %c0_31 = arith.constant 0 : index
    %c0_32 = arith.constant 0 : index
    %c0_33 = arith.constant 0 : index
    %63 = vector.load %arg8[%c0_30, %c0_31, %c0_32, %c0_33] : memref<1x2x16x16xf32, #tpu.memory_space<vmem>>, vector<1x1x16x16xf32>
    %64 = vector.shape_cast %63 : vector<1x1x16x16xf32> to vector<16x16xf32>
    %65 = vector.shape_cast %62 : vector<16x16xf32> to vector<1x1x16x16xf32>
    tpu.vector_store %arg8[%c0_30, %c0_31, %c0_32, %c0_33], %65 {strides = array<i32>} : memref<1x2x16x16xf32, #tpu.memory_space<vmem>>, vector<1x1x16x16xf32>,
    %66 = vector.shape_cast %61 : vector<1x16x16xf32> to vector<16x16xf32>
    %c0_34 = arith.constant 0 : index
    %c1 = arith.constant 1 : index
    %c0_35 = arith.constant 0 : index
    %c0_36 = arith.constant 0 : index
    %67 = vector.load %arg8[%c0_34, %c1, %c0_35, %c0_36] : memref<1x2x16x16xf32, #tpu.memory_space<vmem>>, vector<1x1x16x16xf32>
    %68 = vector.shape_cast %67 : vector<1x1x16x16xf32> to vector<16x16xf32>
    %69 = vector.shape_cast %66 : vector<16x16xf32> to vector<1x1x16x16xf32>
    tpu.vector_store %arg8[%c0_34, %c1, %c0_35, %c0_36], %69 {strides = array<i32>} : memref<1x2x16x16xf32, #tpu.memory_space<vmem>>, vector<1x1x16x16xf32>,
    return
  }
  func.func @transform_0(%arg0: i32) -> (i32, i32, i32, i32) {
    %c0_i32 = arith.constant 0 : i32
    %c0_i32_0 = arith.constant 0 : i32
    %c0_i32_1 = arith.constant 0 : i32
    %c0_i32_2 = arith.constant 0 : i32
    return %arg0, %c0_i32, %c0_i32_0, %c0_i32_1 : i32, i32, i32, i32
  }
  func.func @transform_1(%arg0: i32) -> (i32, i32, i32, i32) {
    %c0_i32 = arith.constant 0 : i32
    %c0_i32_0 = arith.constant 0 : i32
    %c0_i32_1 = arith.constant 0 : i32
    %c0_i32_2 = arith.constant 0 : i32
    return %arg0, %c0_i32, %c0_i32_0, %c0_i32_1 : i32, i32, i32, i32
  }
  func.func @transform_2(%arg0: i32) -> (i32, i32, i32, i32) {
    %c0_i32 = arith.constant 0 : i32
    %c0_i32_0 = arith.constant 0 : i32
    %c0_i32_1 = arith.constant 0 : i32
    %c0_i32_2 = arith.constant 0 : i32
    return %arg0, %c0_i32, %c0_i32_0, %c0_i32_1 : i32, i32, i32, i32
  }
  func.func @transform_3(%arg0: i32) -> (i32, i32) {
    %c0_i32 = arith.constant 0 : i32
    %c0_i32_0 = arith.constant 0 : i32
    %c0_i32_1 = arith.constant 0 : i32
    return %c0_i32, %c0_i32_0 : i32, i32
  }
  func.func @transform_4(%arg0: i32) -> (i32, i32) {
    %c0_i32 = arith.constant 0 : i32
    %c0_i32_0 = arith.constant 0 : i32
    %c0_i32_1 = arith.constant 0 : i32
    return %c0_i32, %c0_i32_0 : i32, i32
  }
  func.func @transform_5(%arg0: i32) -> (i32, i32) {
    %c0_i32 = arith.constant 0 : i32
    %c0_i32_0 = arith.constant 0 : i32
    %c0_i32_1 = arith.constant 0 : i32
    return %c0_i32, %c0_i32_0 : i32, i32
  }
  func.func @transform_6(%arg0: i32) -> (i32, i32) {
    %c0_i32 = arith.constant 0 : i32
    %c0_i32_0 = arith.constant 0 : i32
    %c0_i32_1 = arith.constant 0 : i32
    return %c0_i32, %c0_i32_0 : i32, i32
  }
  func.func @transform_7(%arg0: i32) -> (i32, i32, i32, i32) {
    %c0_i32 = arith.constant 0 : i32
    %c0_i32_0 = arith.constant 0 : i32
    %c0_i32_1 = arith.constant 0 : i32
    %c0_i32_2 = arith.constant 0 : i32
    return %arg0, %c0_i32, %c0_i32_0, %c0_i32_1 : i32, i32, i32, i32
  }
}

module attributes {stable_mosaic.version = 11 : i64} {
  func.func @_dc_kernel(%arg0: i32, %arg1: memref<1x2x16x16xf32, #tpu.memory_space<vmem>>, %arg2: memref<1x2x16x16xf32, #tpu.memory_space<vmem>>, %arg3: memref<1x1x16x16xf32, #tpu.memory_space<vmem>>, %arg4: memref<16x16xf32, #tpu.memory_space<vmem>>, %arg5: memref<16x16xf32, #tpu.memory_space<vmem>>, %arg6: memref<16x16xf32, #tpu.memory_space<vmem>>, %arg7: memref<16x16xf32, #tpu.memory_space<vmem>>, %arg8: memref<1x2x16x16xf32, #tpu.memory_space<vmem>>) attributes {dimension_semantics = [#tpu.dimension_semantics<parallel>], iteration_bounds = array<i64: 2>, scalar_prefetch = 0 : i64, scratch_operands = 0 : i64, tpu.core_type = #tpu.core_type<tc>, window_params = [{transform_indices = @transform_0, window_bounds = array<i64: 1, 2, 16, 16>}, {transform_indices = @transform_1, window_bounds = array<i64: 1, 2, 16, 16>}, {transform_indices = @transform_2, window_bounds = array<i64: 1, 1, 16, 16>}, {pipeline_mode = #tpu.pipeline_mode<synchronous>, transform_indices = @transform_3, window_bounds = array<i64: 16, 16>}, {pipeline_mode = #tpu.pipeline_mode<synchronous>, transform_indices = @transform_4, window_bounds = array<i64: 16, 16>}, {pipeline_mode = #tpu.pipeline_mode<synchronous>, transform_indices = @transform_5, window_bounds = array<i64: 16, 16>}, {pipeline_mode = #tpu.pipeline_mode<synchronous>, transform_indices = @transform_6, window_bounds = array<i64: 16, 16>}, {transform_indices = @transform_7, window_bounds = array<i64: 1, 2, 16, 16>}]} {
    %c0 = arith.constant 0 : index
    %c0_0 = arith.constant 0 : index
    %0 = vector.load %arg4[%c0, %c0_0] : memref<16x16xf32, #tpu.memory_space<vmem>>, vector<16x16xf32>
    %c0_1 = arith.constant 0 : index
    %c0_2 = arith.constant 0 : index
    %1 = vector.load %arg5[%c0_1, %c0_2] : memref<16x16xf32, #tpu.memory_space<vmem>>, vector<16x16xf32>
    %c0_3 = arith.constant 0 : index
    %c0_4 = arith.constant 0 : index
    %2 = vector.load %arg6[%c0_3, %c0_4] : memref<16x16xf32, #tpu.memory_space<vmem>>, vector<16x16xf32>
    %c0_5 = arith.constant 0 : index
    %c0_6 = arith.constant 0 : index
    %3 = vector.load %arg7[%c0_5, %c0_6] : memref<16x16xf32, #tpu.memory_space<vmem>>, vector<16x16xf32>
    %c0_7 = arith.constant 0 : index
    %c0_8 = arith.constant 0 : index
    %c0_9 = arith.constant 0 : index
    %c0_10 = arith.constant 0 : index
    %4 = vector.load %arg1[%c0_7, %c0_8, %c0_9, %c0_10] : memref<1x2x16x16xf32, #tpu.memory_space<vmem>>, vector<1x2x16x16xf32>
    %c0_11 = arith.constant 0 : index
    %c0_12 = arith.constant 0 : index
    %c0_13 = arith.constant 0 : index
    %c0_14 = arith.constant 0 : index
    %5 = vector.load %arg2[%c0_11, %c0_12, %c0_13, %c0_14] : memref<1x2x16x16xf32, #tpu.memory_space<vmem>>, vector<1x2x16x16xf32>
    %c0_15 = arith.constant 0 : index
    %c0_16 = arith.constant 0 : index
    %c0_17 = arith.constant 0 : index
    %c0_18 = arith.constant 0 : index
    %6 = vector.load %arg3[%c0_15, %c0_16, %c0_17, %c0_18] : memref<1x1x16x16xf32, #tpu.memory_space<vmem>>, vector<1x1x16x16xf32>
    %7 = vector.extract_strided_slice %4 {offsets = [0, 0, 0, 0], sizes = [1, 1, 16, 16], strides = [1, 1, 1, 1]} : vector<1x2x16x16xf32> to vector<1x1x16x16xf32>
    %8 = vector.shape_cast %7 : vector<1x1x16x16xf32> to vector<1x16x16xf32>
    %9 = vector.shape_cast %8 : vector<1x16x16xf32> to vector<16x16xf32>
    %10 = vector.extract_strided_slice %4 {offsets = [0, 1, 0, 0], sizes = [1, 1, 16, 16], strides = [1, 1, 1, 1]} : vector<1x2x16x16xf32> to vector<1x1x16x16xf32>
    %11 = vector.shape_cast %10 : vector<1x1x16x16xf32> to vector<1x16x16xf32>
    %12 = vector.shape_cast %11 : vector<1x16x16xf32> to vector<16x16xf32>
    %cst = arith.constant dense<0.000000e+00> : vector<16x16xf32>
    %13 = tpu.matmul %9, %2, %cst {dimension_numbers = #tpu.dot_dimension_numbers<[1], [0], [0], [1], [0, 0, 1, 1], [], []>} : vector<16x16xf32>, vector<16x16xf32>, vector<16x16xf32> -> vector<16x16xf32>
    %cst_19 = arith.constant dense<0.000000e+00> : vector<16x16xf32>
    %14 = tpu.matmul %12, %3, %cst_19 {dimension_numbers = #tpu.dot_dimension_numbers<[1], [0], [0], [1], [0, 0, 1, 1], [], []>} : vector<16x16xf32>, vector<16x16xf32>, vector<16x16xf32> -> vector<16x16xf32>
    %15 = arith.addf %9, %12 : vector<16x16xf32>
    %16 = arith.addf %2, %3 : vector<16x16xf32>
    %cst_20 = arith.constant dense<0.000000e+00> : vector<16x16xf32>
    %17 = tpu.matmul %15, %16, %cst_20 {dimension_numbers = #tpu.dot_dimension_numbers<[1], [0], [0], [1], [0, 0, 1, 1], [], []>} : vector<16x16xf32>, vector<16x16xf32>, vector<16x16xf32> -> vector<16x16xf32>
    %18 = arith.subf %13, %14 : vector<16x16xf32>
    %19 = arith.subf %17, %13 : vector<16x16xf32>
    %20 = arith.subf %19, %14 : vector<16x16xf32>
    %21 = vector.shape_cast %18 : vector<16x16xf32> to vector<1x16x16xf32>
    %22 = vector.shape_cast %20 : vector<16x16xf32> to vector<1x16x16xf32>
    %23 = arith.addf %0, %1 : vector<16x16xf32>
    %24 = arith.subf %0, %1 : vector<16x16xf32>
    %25 = vector.shape_cast %21 : vector<1x16x16xf32> to vector<16x16xf32>
    %26 = vector.shape_cast %22 : vector<1x16x16xf32> to vector<16x16xf32>
    %cst_21 = arith.constant dense<0.000000e+00> : vector<16x16xf32>
    %27 = tpu.matmul %0, %25, %cst_21 {dimension_numbers = #tpu.dot_dimension_numbers<[1], [0], [0], [1], [0, 0, 1, 1], [], []>} : vector<16x16xf32>, vector<16x16xf32>, vector<16x16xf32> -> vector<16x16xf32>
    %cst_22 = arith.constant dense<0.000000e+00> : vector<16x16xf32>
    %28 = tpu.matmul %1, %26, %cst_22 {dimension_numbers = #tpu.dot_dimension_numbers<[1], [0], [0], [1], [0, 0, 1, 1], [], []>} : vector<16x16xf32>, vector<16x16xf32>, vector<16x16xf32> -> vector<16x16xf32>
    %29 = arith.addf %25, %26 : vector<16x16xf32>
    %cst_23 = arith.constant dense<0.000000e+00> : vector<16x16xf32>
    %30 = tpu.matmul %23, %29, %cst_23 {dimension_numbers = #tpu.dot_dimension_numbers<[1], [0], [0], [1], [0, 0, 1, 1], [], []>} : vector<16x16xf32>, vector<16x16xf32>, vector<16x16xf32> -> vector<16x16xf32>
    %31 = arith.subf %27, %28 : vector<16x16xf32>
    %32 = arith.subf %30, %27 : vector<16x16xf32>
    %33 = arith.subf %32, %28 : vector<16x16xf32>
    %34 = vector.shape_cast %6 : vector<1x1x16x16xf32> to vector<16x16xf32>
    %35 = vector.extract_strided_slice %5 {offsets = [0, 0, 0, 0], sizes = [1, 1, 16, 16], strides = [1, 1, 1, 1]} : vector<1x2x16x16xf32> to vector<1x1x16x16xf32>
    %36 = vector.shape_cast %35 : vector<1x1x16x16xf32> to vector<16x16xf32>
    %37 = arith.subf %36, %31 : vector<16x16xf32>
    %38 = arith.mulf %34, %37 : vector<16x16xf32>
    %39 = arith.addf %31, %38 : vector<16x16xf32>
    %40 = vector.extract_strided_slice %5 {offsets = [0, 1, 0, 0], sizes = [1, 1, 16, 16], strides = [1, 1, 1, 1]} : vector<1x2x16x16xf32> to vector<1x1x16x16xf32>
    %41 = vector.shape_cast %40 : vector<1x1x16x16xf32> to vector<16x16xf32>
    %42 = arith.subf %41, %33 : vector<16x16xf32>
    %43 = arith.mulf %34, %42 : vector<16x16xf32>
    %44 = arith.addf %33, %43 : vector<16x16xf32>
    %cst_24 = arith.constant dense<0.000000e+00> : vector<16x16xf32>
    %45 = tpu.matmul %0, %39, %cst_24 {dimension_numbers = #tpu.dot_dimension_numbers<[1], [0], [0], [1], [0, 0, 1, 1], [], []>} : vector<16x16xf32>, vector<16x16xf32>, vector<16x16xf32> -> vector<16x16xf32>
    %cst_25 = arith.constant dense<0.000000e+00> : vector<16x16xf32>
    %46 = tpu.matmul %1, %44, %cst_25 {dimension_numbers = #tpu.dot_dimension_numbers<[1], [0], [0], [1], [0, 0, 1, 1], [], []>} : vector<16x16xf32>, vector<16x16xf32>, vector<16x16xf32> -> vector<16x16xf32>
    %47 = arith.addf %39, %44 : vector<16x16xf32>
    %cst_26 = arith.constant dense<0.000000e+00> : vector<16x16xf32>
    %48 = tpu.matmul %24, %47, %cst_26 {dimension_numbers = #tpu.dot_dimension_numbers<[1], [0], [0], [1], [0, 0, 1, 1], [], []>} : vector<16x16xf32>, vector<16x16xf32>, vector<16x16xf32> -> vector<16x16xf32>
    %49 = arith.addf %45, %46 : vector<16x16xf32>
    %50 = arith.subf %48, %45 : vector<16x16xf32>
    %51 = arith.addf %50, %46 : vector<16x16xf32>
    %cst_27 = arith.constant dense<0.000000e+00> : vector<16x16xf32>
    %52 = tpu.matmul %49, %2, %cst_27 {dimension_numbers = #tpu.dot_dimension_numbers<[1], [0], [0], [1], [0, 0, 1, 1], [], []>} : vector<16x16xf32>, vector<16x16xf32>, vector<16x16xf32> -> vector<16x16xf32>
    %cst_28 = arith.constant dense<0.000000e+00> : vector<16x16xf32>
    %53 = tpu.matmul %51, %3, %cst_28 {dimension_numbers = #tpu.dot_dimension_numbers<[1], [0], [0], [1], [0, 0, 1, 1], [], []>} : vector<16x16xf32>, vector<16x16xf32>, vector<16x16xf32> -> vector<16x16xf32>
    %54 = arith.addf %49, %51 : vector<16x16xf32>
    %55 = arith.subf %2, %3 : vector<16x16xf32>
    %cst_29 = arith.constant dense<0.000000e+00> : vector<16x16xf32>
    %56 = tpu.matmul %54, %55, %cst_29 {dimension_numbers = #tpu.dot_dimension_numbers<[1], [0], [0], [1], [0, 0, 1, 1], [], []>} : vector<16x16xf32>, vector<16x16xf32>, vector<16x16xf32> -> vector<16x16xf32>
    %57 = arith.addf %52, %53 : vector<16x16xf32>
    %58 = arith.subf %56, %52 : vector<16x16xf32>
    %59 = arith.addf %58, %53 : vector<16x16xf32>
    %60 = vector.shape_cast %57 : vector<16x16xf32> to vector<1x16x16xf32>
    %61 = vector.shape_cast %59 : vector<16x16xf32> to vector<1x16x16xf32>
    %62 = vector.shape_cast %60 : vector<1x16x16xf32> to vector<16x16xf32>
    %c0_30 = arith.constant 0 : index
    %c0_31 = arith.constant 0 : index
    %c0_32 = arith.constant 0 : index
    %c0_33 = arith.constant 0 : index
    %63 = vector.load %arg8[%c0_30, %c0_31, %c0_32, %c0_33] : memref<1x2x16x16xf32, #tpu.memory_space<vmem>>, vector<1x1x16x16xf32>
    %64 = vector.shape_cast %63 : vector<1x1x16x16xf32> to vector<16x16xf32>
    %65 = vector.shape_cast %62 : vector<16x16xf32> to vector<1x1x16x16xf32>
    tpu.vector_store %arg8[%c0_30, %c0_31, %c0_32, %c0_33], %65 {strides = array<i32>} : memref<1x2x16x16xf32, #tpu.memory_space<vmem>>, vector<1x1x16x16xf32>,
    %66 = vector.shape_cast %61 : vector<1x16x16xf32> to vector<16x16xf32>
    %c0_34 = arith.constant 0 : index
    %c1 = arith.constant 1 : index
    %c0_35 = arith.constant 0 : index
    %c0_36 = arith.constant 0 : index
    %67 = vector.load %arg8[%c0_34, %c1, %c0_35, %c0_36] : memref<1x2x16x16xf32, #tpu.memory_space<vmem>>, vector<1x1x16x16xf32>
    %68 = vector.shape_cast %67 : vector<1x1x16x16xf32> to vector<16x16xf32>
    %69 = vector.shape_cast %66 : vector<16x16xf32> to vector<1x1x16x16xf32>
    tpu.vector_store %arg8[%c0_34, %c1, %c0_35, %c0_36], %69 {strides = array<i32>} : memref<1x2x16x16xf32, #tpu.memory_space<vmem>>, vector<1x1x16x16xf32>,
    return
  }
  func.func @transform_0(%arg0: i32) -> (i32, i32, i32, i32) {
    %c0_i32 = arith.constant 0 : i32
    %c0_i32_0 = arith.constant 0 : i32
    %c0_i32_1 = arith.constant 0 : i32
    %c0_i32_2 = arith.constant 0 : i32
    return %arg0, %c0_i32, %c0_i32_0, %c0_i32_1 : i32, i32, i32, i32
  }
  func.func @transform_1(%arg0: i32) -> (i32, i32, i32, i32) {
    %c0_i32 = arith.constant 0 : i32
    %c0_i32_0 = arith.constant 0 : i32
    %c0_i32_1 = arith.constant 0 : i32
    %c0_i32_2 = arith.constant 0 : i32
    return %arg0, %c0_i32, %c0_i32_0, %c0_i32_1 : i32, i32, i32, i32
  }
  func.func @transform_2(%arg0: i32) -> (i32, i32, i32, i32) {
    %c0_i32 = arith.constant 0 : i32
    %c0_i32_0 = arith.constant 0 : i32
    %c0_i32_1 = arith.constant 0 : i32
    %c0_i32_2 = arith.constant 0 : i32
    return %arg0, %c0_i32, %c0_i32_0, %c0_i32_1 : i32, i32, i32, i32
  }
  func.func @transform_3(%arg0: i32) -> (i32, i32) {
    %c0_i32 = arith.constant 0 : i32
    %c0_i32_0 = arith.constant 0 : i32
    %c0_i32_1 = arith.constant 0 : i32
    return %c0_i32, %c0_i32_0 : i32, i32
  }
  func.func @transform_4(%arg0: i32) -> (i32, i32) {
    %c0_i32 = arith.constant 0 : i32
    %c0_i32_0 = arith.constant 0 : i32
    %c0_i32_1 = arith.constant 0 : i32
    return %c0_i32, %c0_i32_0 : i32, i32
  }
  func.func @transform_5(%arg0: i32) -> (i32, i32) {
    %c0_i32 = arith.constant 0 : i32
    %c0_i32_0 = arith.constant 0 : i32
    %c0_i32_1 = arith.constant 0 : i32
    return %c0_i32, %c0_i32_0 : i32, i32
  }
  func.func @transform_6(%arg0: i32) -> (i32, i32) {
    %c0_i32 = arith.constant 0 : i32
    %c0_i32_0 = arith.constant 0 : i32
    %c0_i32_1 = arith.constant 0 : i32
    return %c0_i32, %c0_i32_0 : i32, i32
  }
  func.func @transform_7(%arg0: i32) -> (i32, i32, i32, i32) {
    %c0_i32 = arith.constant 0 : i32
    %c0_i32_0 = arith.constant 0 : i32
    %c0_i32_1 = arith.constant 0 : i32
    %c0_i32_2 = arith.constant 0 : i32
    return %arg0, %c0_i32, %c0_i32_0, %c0_i32_1 : i32, i32, i32, i32
  }
}

</mosaic_0001>

<bundles_post_ra>
// kernel: tpu_custom_call.1
= control target key start
LH: loop header
LB: loop body
LE: loop exit
PB: predicated region body
PF: predicated region fallthrough
CT: control target
= control target key end

     0   :  { %s2792_s0 = inlined_call_operand.hbm [shape: f32[2,2,16,16], index: 0, kind: input, shape index: {}]   ;;  %s2793_s1 = inlined_call_operand.hbm [shape: f32[2,2,16,16], index: 1, kind: input, shape index: {}]   ;;  %s2794_s2 = inlined_call_operand.hbm [shape: f32[2,1,16,16], index: 2, kind: input, shape index: {}]   ;;  %s2795_s3 = inlined_call_operand.hbm [shape: f32[16,16], index: 3, kind: input, shape index: {}]   ;;  %s2796_s4 = inlined_call_operand.hbm [shape: f32[16,16], index: 4, kind: input, shape index: {}]   ;;  %s2797_s5 = inlined_call_operand.hbm [shape: f32[16,16], index: 5, kind: input, shape index: {}]   ;;  %s2798_s6 = inlined_call_operand.hbm [shape: f32[16,16], index: 6, kind: input, shape index: {}]   ;;  %s2799_s7 = inlined_call_operand.hbm [shape: f32[2,2,16,16], index: 7, kind: output, shape index: {}]  }
   0x1   :  { %2823 = sst [smem:[#allocation25_spill]] %s2793_s1 }
   0x2   :  { %2824 = sst [smem:[#allocation26_spill]] %s2795_s3 }
   0x3   :  { %2825 = sst [smem:[#allocation27_spill]] %s2797_s5 }
   0x4   :  { %12 = vsyncpa [#allocation3], 0 }
   0x5   :  { %14 = vsyncpa [#allocation3 + $0x1], 0 }
   0x6   :  { %15 = vsyncpa [#allocation6], 0 }
   0x7   :  { %17 = vsyncpa [#allocation6 + $0x1], 0 }
   0x8   :  { %18 = vsyncpa [#allocation9], 0 }
   0x9   :  { %19 = vsyncpa [#allocation12], 0 }
   0xa   :  { %20 = vsyncpa [#allocation4], 0 }
   0xb   :  { %22 = vsyncpa [#allocation4 + $0x1], 0  ;;  %s2311_s24 = smov 0   ;;  %s2313_s25 = smov 0  }
   0xc   :  { %s2315_s26 = smov 0   ;;  %s2317_s27 = smov 0  }
   0xd LB: > { %2826 = sst [smem:[#allocation20_spill]] %s2245_s24  ;;  %s2332_s28 = sadd.s32 4294967295, %s2257_s27   ;;  %s2257_s27 = sphi %s2317_s27, %s2862_s27   ;;  %s2253_s26 = sphi %s2315_s26, %s2864_s26   ;;  %s2249_s25 = sphi %s2313_s25, %s2866_s25   ;;  %s2245_s24 = sphi %s2311_s24, %s2865_s24  }
   0xe   : > { %2827 = sst [smem:[#allocation21_spill]] %s2253_s26  ;;  %s1636_s29 = sadd.s32 4294967294, %s2257_s27  }
   0xf   : > { %p48_p0 = scmp.ne.s32.totalorder %s2249_s25, %s2245_s24  ;;  %p2800_p1 = scmp.eq.s32.totalorder %s2332_s28, 0 }
  0x10   : > { %p214_p3 = scmp.eq.s32.totalorder %s1636_s29, 1  ;;  %p1637_p5 = scmp.ge.s32.totalorder %s2257_s27, 1 }
  0x11   : > { %p2341_p4 = por %p2800_p1, %p48_p0  ;;  %p221_p7 = scmp.lt.s32.totalorder %s2257_s27, 3 }
  0x12   : > { %p2346_p6 = por %p214_p3, %p48_p0  ;;  %s2259_s10 = smov [#allocation8]  }
  0x13   : > { %s2828_s30 = scalar_select %p2341_p4, 1, 0 }
  0x14   : > { %s2829_s8 = scalar_select %p2346_p6, 1, 0 }
  0x15   : > { %p2351_p8 = pnand %p1637_p5, %p221_p7  ;;  %s233_s11 = sshll.u32 %s2259_s10, 4  ;;  %s2355_s11 = int_to_ptr.vmem [resolvable:$true] %s233_s11 }
  0x16   : > { %2830 = sst [smem:[#allocation22_spill]] %s2829_s8  ;;  %s2260_s13 = smov [#allocation11]  }
  0x17   : > { %s2831_s9 = scalar_select %p2351_p8, 1, 0 }
  0x18   : > { %p1900_p9 = pneg %p2351_p8  ;;  %s259_s14 = sshll.u32 %s2260_s13, 4  ;;  %s2366_s14 = int_to_ptr.vmem [resolvable:$true] %s259_s14 }
  0x19   : > { %s2833_s3 = sld [smem:[#allocation26_spill]] }
  0x1a   : > { %p2362_p11 = pnand %p1900_p9, %p2800_p1 }
  0x1c   : > { %s2832_s12 = scalar_select %p2362_p11, 1, 0 }
  0x1d   : > { %p2376_p13 = pneg %p2362_p11 }
  0x1f   : > { %s1977_s17 = scalar_lea.hbm %s2833_s3, 256 }
  0x20   : > { %p1978_p12 = scmp.ne.s32.totalorder %s2833_s3, %s1977_s17  ;;  %p1984_p5 = scmp.lt.u32.totalorder %s1977_s17, %s2833_s3 }
  0x21   : > { %s2834_s20 = scalar_select %p2376_p13, 1, 0 }
  0x22   : > { %p1980_p0 = pnand %p2376_p13, %p1978_p12 }
  0x24   : > { %p1981_p3 = pneg %p1980_p0 }
  0x26   : > { %p1986_p7 = pnand %p1984_p5, %p1981_p3 }
  0x28   : > { %1989 = shalt.err (!%p1986_p7)
}
  0x29   : > { %s1990_s23 = scalar_lea.vmem %s2355_s11, 256  ;;  %p1998_p2 = scmp.lt.s32.totalorder %s2355_s11, %s2355_s11 }
  0x2a   : > { %p1991_p9 = scmp.ne.s32.totalorder %s2355_s11, %s1990_s23  ;;  %p1999_p6 = scmp.lt.s32.totalorder %s1990_s23, %s1990_s23 }
  0x2c   : > { %p1993_p10 = pnand %p1991_p9, %p2376_p13  ;;  %p2000_p12 = por %p1999_p6, %p1998_p2 }
  0x2e   : > { %p1994_p1 = pneg %p1993_p10 }
  0x30   : > { %p2001_p0 = pnand %p2000_p12, %p1994_p1 }
  0x32   : > { %2004 = shalt.err (!%p2001_p0)
}
  0x33   : > { %s2801_s29 = smov 128   ;;  %s2803_s10 = smov 8  }
  0x34   : > { %1903 = dma.hbm_to_vmem [thread:$0]  (!%p2362_p11), %s2833_s3, 256, %s2355_s11, [#allocation9], %s2801_s29, %s2801_s29, %s2803_s10  }
  0x35   : > { %s2835_s5 = sld [smem:[#allocation27_spill]] }
  0x3b   : > { %s2005_s18 = scalar_lea.hbm %s2835_s5, 256 }
  0x3c   : > { %p2006_p1 = scmp.ne.s32.totalorder %s2835_s5, %s2005_s18  ;;  %p2012_p10 = scmp.lt.u32.totalorder %s2005_s18, %s2835_s5 }
  0x3e   : > { %p2008_p2 = pnand %p2006_p1, %p2376_p13 }
  0x40   : > { %p2009_p6 = pneg %p2008_p2 }
  0x42   : > { %p2014_p3 = pnand %p2012_p10, %p2009_p6 }
  0x44   : > { %2017 = shalt.err (!%p2014_p3)
}
  0x45   : > { %s2018_s11 = scalar_lea.vmem %s2366_s14, 256  ;;  %p2026_p12 = scmp.lt.s32.totalorder %s2366_s14, %s2366_s14 }
  0x46   : > { %p2019_p5 = scmp.ne.s32.totalorder %s2366_s14, %s2018_s11  ;;  %p2027_p0 = scmp.lt.s32.totalorder %s2018_s11, %s2018_s11 }
  0x48   : > { %p2021_p7 = pnand %p2019_p5, %p2376_p13  ;;  %p2028_p1 = por %p2027_p0, %p2026_p12 }
  0x4a   : > { %p2022_p9 = pneg %p2021_p7 }
  0x4c   : > { %p2029_p2 = pnand %p2028_p1, %p2022_p9 }
  0x4e   : > { %2032 = shalt.err (!%p2029_p2)
}
  0x4f   : > { %1909 = dma.hbm_to_vmem [thread:$0]  (!%p2362_p11), %s2835_s5, 256, %s2366_s14, [#allocation12], %s2801_s29, %s2801_s29, %s2803_s10  }
  0x50   : > { %s2427_s16 = sadd.s32 1, %s2257_s27   ;;  %s35_s17 = sadd.s32 1, %s2253_s26 }
  0x51   : > { %2836 = sst [smem:[#allocation23_spill]] %s2427_s16  ;;  %s32_s18 = ssub.s32 %s2257_s27, %s2427_s16 }
  0x52   : > { %p42_p6 = scmp.ne.s32.totalorder %s2253_s26, %s2249_s25  ;;  %p33_p10 = scmp.eq.s32.totalorder %s32_s18, 0 }
  0x53   : > { %p43_p3 = scmp.eq.s32.totalorder %s2257_s27, 0  ;;  %p2837_p5 = scmp.eq.s32.totalorder %s2332_s28, 1 }
  0x54   : > { %p1931_p9 = scmp.lt.s32.totalorder %s2257_s27, 2  ;;  %s2446_s22 = sand.u32 1, %s2253_s26  }
  0x55   : > { %p2437_p7 = por %p2837_p5, %p42_p6  ;;  %p44_p12 = por %p43_p3, %p42_p6 }
  0x56   : > { %s2443_s21 = scalar_select %p33_p10, %s2253_s26, %s35_s17  }
  0x57   : > { %s2838_s19 = scalar_select %p2437_p7, 1, 0 }
  0x58   : > { %2839 = sst [smem:[#allocation24_spill]] %s2443_s21  ;;  %s2806_s14 = sshll.u32 %s2446_s22, 5 }
  0x59   : > { %s2807_s23 = sshll.u32 %s2257_s27, 9  ;;  %p2450_p0 = pnand %p1931_p9, %p44_p12 }
  0x5a   : > { %s307_s13 = sand.u32 1, %s2257_s27   ;;  %s2841_s1 = sld [smem:[#allocation25_spill]] }
  0x5b   : > { %s2840_s11 = scalar_select %p2450_p0, 1, 0 }
  0x5c   : > { %s311_s17 = scalar_lea.vmem [#allocation5], %s2806_s14  ;;  %s2263_s3 = smov [#allocation10]  }
  0x5d   : > { %s318_s10 = sshll.u32 %s311_s17, 4  ;;  %s2466_s5 = sshll.u32 %s2263_s3, 4  ;;  %s2464_s10 = int_to_ptr.vmem [resolvable:$true] %s318_s10  ;;  %s247_s5 = int_to_ptr.vmem [resolvable:$true] %s2466_s5 }
  0x5e   : > { %s2468_s21 = scalar_lea.sflag [#allocation6], %s307_s13  ;;  %p2474_p2 = pneg %p2450_p0 }
  0x60   : > { %s2460_s29 = scalar_lea.hbm %s2841_s1, %s2807_s23  ;;  %s2038_s14 = scalar_lea.hbm %s2841_s1, 1024 }
  0x61   : > { %s2033_s26 = scalar_lea.hbm %s2460_s29, 512  ;;  %p2039_p3 = scmp.lt.u32.totalorder %s2460_s29, %s2841_s1 }
  0x62   : > { %p2034_p1 = scmp.ne.s32.totalorder %s2460_s29, %s2033_s26  ;;  %p2040_p5 = scmp.lt.u32.totalorder %s2038_s14, %s2033_s26 }
  0x63   : > { %s2842_s15 = scalar_select %p2474_p2, 1, 0 }
  0x64   : > { %p2036_p6 = pnand %p2474_p2, %p2034_p1  ;;  %p2041_p9 = por %p2040_p5, %p2039_p3 }
  0x65   : > { %p2042_p12 = scmp.lt.u32.totalorder %s2033_s26, %s2460_s29 }
  0x66   : > { %p2037_p10 = pneg %p2036_p6 }
  0x67   : > { %p2043_p7 = por %p2042_p12, %p2041_p9 }
  0x69   : > { %p2044_p4 = pnand %p2043_p7, %p2037_p10 }
  0x6b   : > { %2047 = shalt.err (!%p2044_p4)
}
  0x6c   : > { %s2048_s13 = scalar_lea.vmem %s2464_s10, 512  ;;  %s2264_s18 = smov [#allocation5]  }
  0x6d   : > { %p2049_p1 = scmp.ne.s32.totalorder %s2464_s10, %s2048_s13  ;;  %s2053_s17 = sshll.u32 %s2264_s18, 4  ;;  %s2054_s17 = int_to_ptr.vmem [resolvable:$false] %s2053_s17 }
  0x6e   : > { %s2055_s23 = scalar_lea.vmem %s2054_s17, 1024  ;;  %p2056_p11 = scmp.lt.s32.totalorder %s2464_s10, %s2054_s17 }
  0x6f   : > { %p2051_p6 = pnand %p2049_p1, %p2474_p2  ;;  %p2057_p13 = scmp.lt.s32.totalorder %s2055_s23, %s2048_s13 }
  0x71   : > { %p2052_p8 = pneg %p2051_p6  ;;  %p2058_p3 = por %p2057_p13, %p2056_p11 }
  0x73   : > { %p2059_p5 = pnand %p2058_p3, %p2052_p8 }
  0x75   : > { %2062 = shalt.err (!%p2059_p5)
}
  0x76   : > { %s2843_s26 = smov 8   ;;  %s2844_s14 = smov 128  }
  0x77   : > { %1919 = dma.hbm_to_vmem [thread:$0]  (!%p2450_p0), %s2460_s29, 512, %s2464_s10, %s2468_s21, %s2844_s14, %s2844_s14, %s2843_s26  }
  0x78   : > { %s2063_s17 = scalar_lea.hbm %s2796_s4, 256  ;;  %p2845_p8 = scmp.ne.s32.totalorder %s2834_s20, 0 }
  0x79   : > { %p2064_p4 = scmp.ne.s32.totalorder %s2796_s4, %s2063_s17  ;;  %p2070_p7 = scmp.lt.u32.totalorder %s2063_s17, %s2796_s4 }
  0x7b   : > { %p2066_p11 = pnand %p2064_p4, %p2845_p8 }
  0x7d   : > { %p2067_p13 = pneg %p2066_p11 }
  0x7f   : > { %p2072_p10 = pnand %p2070_p7, %p2067_p13 }
  0x81   : > { %2075 = shalt.err (!%p2072_p10)
}
  0x82   : > { %s2076_s8 = scalar_lea.vmem %s247_s5, 256  ;;  %p2084_p6 = scmp.lt.s32.totalorder %s247_s5, %s247_s5 }
  0x83   : > { %p2077_p9 = scmp.ne.s32.totalorder %s247_s5, %s2076_s8  ;;  %p2085_p3 = scmp.lt.s32.totalorder %s2076_s8, %s2076_s8 }
  0x85   : > { %p2079_p12 = pnand %p2077_p9, %p2845_p8  ;;  %p2086_p5 = por %p2085_p3, %p2084_p6 }
  0x87   : > { %p2080_p1 = pneg %p2079_p12 }
  0x89   : > { %p2087_p0 = pnand %p2086_p5, %p2080_p1 }
  0x8b   : > { %2090 = shalt.err (!%p2087_p0)
}
  0x8c   : > { %p2846_p4 = scmp.ne.s32.totalorder %s2832_s12, 0  ;;  %s2265_s10 = smov [#allocation13]  }
  0x8d   : > { %s272_s16 = sshll.u32 %s2265_s10, 4  ;;  %s2091_s8 = scalar_lea.hbm %s2798_s6, 256  ;;  %s273_s16 = int_to_ptr.vmem [resolvable:$true] %s272_s16 }
  0x8e   : > { %1906 = dma.hbm_to_vmem [thread:$0]  (!%p2846_p4), %s2796_s4, 256, %s247_s5, [#allocation9], %s2844_s14, %s2844_s14, %s2843_s26  }
  0x8f   : > { %p2092_p0 = scmp.ne.s32.totalorder %s2798_s6, %s2091_s8  ;;  %p2098_p7 = scmp.lt.u32.totalorder %s2091_s8, %s2798_s6 }
  0x91   : > { %p2094_p11 = pnand %p2092_p0, %p2845_p8 }
  0x93   : > { %p2095_p13 = pneg %p2094_p11 }
  0x95   : > { %p2100_p10 = pnand %p2098_p7, %p2095_p13 }
  0x97   : > { %2103 = shalt.err (!%p2100_p10)
}
  0x98   : > { %s2104_s5 = scalar_lea.vmem %s273_s16, 256  ;;  %p2112_p6 = scmp.lt.s32.totalorder %s273_s16, %s273_s16 }
  0x99   : > { %p2105_p9 = scmp.ne.s32.totalorder %s273_s16, %s2104_s5  ;;  %p2113_p3 = scmp.lt.s32.totalorder %s2104_s5, %s2104_s5 }
  0x9b   : > { %p2107_p12 = pnand %p2105_p9, %p2845_p8  ;;  %p2114_p5 = por %p2113_p3, %p2112_p6 }
  0x9d   : > { %p2108_p1 = pneg %p2107_p12 }
  0x9f   : > { %p2115_p2 = pnand %p2114_p5, %p2108_p1 }
  0xa1   : > { %2118 = shalt.err (!%p2115_p2)
}
  0xa2   : > { %1912 = dma.hbm_to_vmem [thread:$0]  (!%p2846_p4), %s2798_s6, 256, %s273_s16, [#allocation12], %s2844_s14, %s2844_s14, %s2843_s26  }
  0xa3   : > { %s2847_s20 = sshll.u32 %s2257_s27, 9  ;;  %s2848_s18 = sshll.u32 %s2446_s22, 5 }
  0xa4   : > { %s2549_s3 = scalar_lea.hbm %s2792_s0, %s2847_s20  ;;  %s290_s12 = scalar_lea.vmem [#allocation2], %s2848_s18 }
  0xa5   : > { %s297_s8 = sshll.u32 %s290_s12, 4  ;;  %s1649_s17 = sshll.u32 %s2446_s22, 4  ;;  %s2553_s8 = int_to_ptr.vmem [resolvable:$true] %s297_s8 }
  0xa6   : > { %s287_s13 = scalar_lea.sflag [#allocation3], %s2446_s22  ;;  %s2119_s23 = scalar_lea.hbm %s2549_s3, 512 }
  0xa7   : > { %p2120_p2 = scmp.ne.s32.totalorder %s2549_s3, %s2119_s23  ;;  %p2849_p8 = scmp.ne.s32.totalorder %s2842_s15, 0 }
  0xa8   : > { %s2124_s24 = scalar_lea.hbm %s2792_s0, 1024  ;;  %p2125_p11 = scmp.lt.u32.totalorder %s2549_s3, %s2792_s0 }
  0xa9   : > { %p2122_p4 = pnand %p2120_p2, %p2849_p8  ;;  %p2126_p13 = scmp.lt.u32.totalorder %s2124_s24, %s2119_s23 }
  0xaa   : > { %p2128_p10 = scmp.lt.u32.totalorder %s2119_s23, %s2549_s3 }
  0xab   : > { %p2123_p0 = pneg %p2122_p4  ;;  %p2127_p7 = por %p2126_p13, %p2125_p11 }
  0xad   : > { %p2129_p9 = por %p2128_p10, %p2127_p7 }
  0xaf   : > { %p2130_p12 = pnand %p2129_p9, %p2123_p0 }
  0xb1   : > { %2133 = shalt.err (!%p2130_p12)
}
  0xb2   : > { %s2134_s29 = scalar_lea.vmem %s2553_s8, 512  ;;  %s2266_s10 = smov [#allocation2]  }
  0xb3   : > { %p2135_p1 = scmp.ne.s32.totalorder %s2553_s8, %s2134_s29  ;;  %s2139_s18 = sshll.u32 %s2266_s10, 4  ;;  %s2140_s18 = int_to_ptr.vmem [resolvable:$false] %s2139_s18 }
  0xb4   : > { %s2141_s12 = scalar_lea.vmem %s2140_s18, 1024  ;;  %p2142_p5 = scmp.lt.s32.totalorder %s2553_s8, %s2140_s18 }
  0xb5   : > { %p2137_p6 = pnand %p2135_p1, %p2849_p8  ;;  %p2143_p2 = scmp.lt.s32.totalorder %s2141_s12, %s2134_s29 }
  0xb7   : > { %p2138_p3 = pneg %p2137_p6  ;;  %p2144_p4 = por %p2143_p2, %p2142_p5 }
  0xb9   : > { %p2145_p11 = pnand %p2144_p4, %p2138_p3 }
  0xbb   : > { %2148 = shalt.err (!%p2145_p11)
}
  0xbc   : > { %p2850_p0 = scmp.ne.s32.totalorder %s2840_s11, 0  ;;  %s1694_s23 = sshll.u32 %s2257_s27, 8 }
  0xbd   : > { %s2587_s24 = scalar_lea.hbm %s2794_s2, %s1694_s23  ;;  %s332_s1 = scalar_lea.vmem [#allocation7], %s1649_s17 }
  0xbe   : > { %1916 = dma.hbm_to_vmem [thread:$0]  (!%p2850_p0), %s2549_s3, 512, %s2553_s8, %s287_s13, %s2844_s14, %s2844_s14, %s2843_s26  }
  0xbf   : > { %s339_s20 = sshll.u32 %s332_s1, 4  ;;  %s2149_s29 = scalar_lea.hbm %s2587_s24, 256  ;;  %s2591_s20 = int_to_ptr.vmem [resolvable:$true] %s339_s20 }
  0xc0   : > { %p2150_p13 = scmp.ne.s32.totalorder %s2587_s24, %s2149_s29  ;;  %s2154_s13 = scalar_lea.hbm %s2794_s2, 512 }
  0xc1   : > { %p2155_p9 = scmp.lt.u32.totalorder %s2587_s24, %s2794_s2  ;;  %p2156_p12 = scmp.lt.u32.totalorder %s2154_s13, %s2149_s29 }
  0xc2   : > { %p2152_p7 = pnand %p2150_p13, %p2849_p8  ;;  %p2158_p6 = scmp.lt.u32.totalorder %s2149_s29, %s2587_s24 }
  0xc3   : > { %p2157_p1 = por %p2156_p12, %p2155_p9 }
  0xc4   : > { %p2153_p10 = pneg %p2152_p7 }
  0xc5   : > { %p2159_p3 = por %p2158_p6, %p2157_p1 }
  0xc7   : > { %p2160_p5 = pnand %p2159_p3, %p2153_p10 }
  0xc9   : > { %2163 = shalt.err (!%p2160_p5)
}
  0xca   : > { %s2164_s22 = scalar_lea.vmem %s2591_s20, 256  ;;  %s2267_s17 = smov [#allocation7]  }
  0xcb   : > { %p2165_p2 = scmp.ne.s32.totalorder %s2591_s20, %s2164_s22  ;;  %s2169_s12 = sshll.u32 %s2267_s17, 4  ;;  %s2170_s12 = int_to_ptr.vmem [resolvable:$false] %s2169_s12 }
  0xcc   : > { %s2171_s23 = scalar_lea.vmem %s2170_s12, 512  ;;  %p2172_p13 = scmp.lt.s32.totalorder %s2591_s20, %s2170_s12 }
  0xcd   : > { %p2167_p4 = pnand %p2165_p2, %p2849_p8  ;;  %p2173_p7 = scmp.lt.s32.totalorder %s2171_s23, %s2164_s22 }
  0xcf   : > { %p2168_p11 = pneg %p2167_p4  ;;  %p2174_p9 = por %p2173_p7, %p2172_p13 }
  0xd1   : > { %p2175_p12 = pnand %p2174_p9, %p2168_p11 }
  0xd3   : > { %2178 = shalt.err (!%p2175_p12)
}
  0xd4   : > { %1922 = dma.hbm_to_vmem [thread:$0]  (!%p2850_p0), %s2587_s24, 256, %s2591_s20, %s2468_s21, %s2844_s14, %s2844_s14, %s2843_s26  }
  0xd5   : > { %p2851_p8 = scmp.ne.s32.totalorder %s2831_s9, 0 }
  0xd6   : > { %s2621_s15 = sand.u32 (!%p2851_p8), 1, %s2249_s25   ;;  %p2852_p10 = scmp.ne.s32.totalorder (!%p2851_p8), %s2828_s30, 0 }
  0xd7   : > { %351 = sbr.rel (%p2851_p8) target bundleno = 1151 (0x47f), region = 48  ;;  %s2624_s16 = sshll.u32 (!%p2851_p8), %s2621_s15, 5 }
  0xd8   : > { %s354_s11 = scalar_lea.sflag (!%p2851_p8), [#allocation3], %s2621_s15  ;;  %s2628_s5 = scalar_lea.vmem (!%p2851_p8), [#allocation2], %s2624_s16 }
  0xde   : > { %2224 = dma.done.wait (%p2852_p10), %s354_s11, 512  }
  0xdf   : > { %2226 = vsyncadd (%p2852_p10), %s354_s11, 4294966784  ;;  %s362_s9 = sand.u32 1, %s2332_s28   ;;  %s2636_s26 = scalar_lea.vmem [#allocation5], %s2624_s16 }
  0xe0   : > { %s363_s21 = scalar_lea.sflag [#allocation6], %s362_s9 }
  0xe1   : > { %2228 = dma.done.wait (%p2852_p10), %s363_s21, 768  }
  0xe2   : > { %2230 = vsyncadd (%p2852_p10), %s363_s21, 4294966528  ;;  %s1655_s14 = sshll.u32 %s2621_s15, 4  ;;  %p2853_p0 = scmp.eq.s32.totalorder %s2332_s28, 0 }
  0xe3   : > { %s2643_s24 = scalar_lea.vmem [#allocation7], %s1655_s14 }
  0xe4   : > { %2232 = dma.done.wait (%p2853_p0), [#allocation9], 512   ;;  %p2854_p1 = pmov %p2853_p0 }
  0xe5   : > { %p2855_p6 = pmov %p2853_p0 }
  0xe6   : > { %2234 = vsyncadd (%p2854_p1), [#allocation9], 4294966784 }
  0xe7   : > { %2236 = dma.done.wait (%p2855_p6), [#allocation12], 512   ;;  %p2856_p3 = pmov %p2853_p0 }
  0xe8   : > { %vm450_vm0 = vcmask 130048   ;;  %v2653_v0 = vld [vmem:[#allocation11] sm:$0xff]  ;;  %v2655_v1 = vld [vmem:[#allocation11 + $0x8] sm:$0xff]  ;;  %v2657_v2 = vld [vmem:[#allocation13] sm:$0xff]  ;;  %s431_s30 = scalar_lea.vmem [#allocation14], %s2624_s16  ;;  %s1695_s20 = sshll.u32 %s2332_s28, 9 }
  0xe9   : > { %2238 = vsyncadd (%p2856_p3), [#allocation12], 4294966784  ;;  %v2661_v3 = vpack.c.bf16 %v2655_v1, %v2653_v0  ;;  %v2663_v4 = vld [vmem:[#allocation13 + $0x8] sm:$0xff]  ;;  %v440_v5 = vld [vmem:[%s2628_s5] sm:$0xff]  ;;  %v615_v7 = vadd.f32 %v2657_v2, %v2653_v0  ;;  %s1482_s1 = sshll.u32 %s431_s30, 4  ;;  %s2746_s8 = scalar_lea.hbm %s2799_s7, %s1695_s20  ;;  %s2740_s1 = int_to_ptr.vmem [resolvable:$true] %s1482_s1 }
  0xea   : > { %v442_v6 = vld [vmem:[%s2628_s5 + $0x10] sm:$0xff]  ;;  %v2671_v8 = vpack.c.bf16 %v2663_v4, %v2657_v2  ;;  %1748 = vmatprep.mubr.msk.f32.mxu0 %vm450_vm0, %v440_v5  ;;  %v616_v9 = vadd.f32 %v2663_v4, %v2655_v1  ;;  %v441_v10 = vld [vmem:[%s2628_s5 + $0x8] sm:$0xff]  ;;  %v443_v13 = vld [vmem:[%s2628_s5 + $0x18] sm:$0xff]  ;;  %s1469_s28 = scalar_lea.sflag [#allocation4], %s2621_s15  ;;  %s2179_s13 = scalar_lea.vmem %s2740_s1, 512 }
  0xeb   : > { %1755 = vmatprep.mubr.msk.f32.mxu1 %vm450_vm0, %v442_v6  ;;  %1829 = vmatprep.subr.bf16.mxu0 %v2661_v3  ;;  %v613_v12 = vadd.f32 %v442_v6, %v440_v5  ;;  %v614_v14 = vadd.f32 %v443_v13, %v441_v10  ;;  %v2687_v15 = vld [vmem:[#allocation8] sm:$0xff]  ;;  %v2691_v16 = vld [vmem:[#allocation10] sm:$0xff]  ;;  %v2695_v30 = vld [vmem:[#allocation8 + $0x8] sm:$0xff]  ;;  %p2180_p5 = scmp.ne.s32.totalorder %s2740_s1, %s2179_s13  ;;  %p2857_p2 = scmp.ne.s32.totalorder %s2838_s19, 0 }
  0xec   : > { %1833 = vmatprep.subr.bf16.mxu1 %v2671_v8  ;;  %1831 = vmatpush3.bf16.msra.mxu0 %v2661_v3  ;;  %v1836_v11 = vpack.c.bf16 %v616_v9, %v615_v7  ;;  %v704_v31 = vadd.f32 %v2691_v16, %v2687_v15  ;;  %v435_v35 = vld [vmem:[#allocation10 + $0x8] sm:$0xff]  ;;  %v445_v40 = vld [vmem:[%s2636_s26 + $0x8] sm:$0xff]  ;;  %v444_v43 = vld [vmem:[%s2636_s26] sm:$0xff]  ;;  %s2268_s10 = smov [#allocation14]  }
  0xed   : > { %1835 = vmatpush3.bf16.msra.mxu1 %v2671_v8  ;;  %v705_v37 = vadd.f32 %v435_v35, %v2695_v30  ;;  %v449_v45 = vld [vmem:[%s2643_s24 + $0x8] sm:$0xff]  ;;  %v448_v49 = vld [vmem:[%s2643_s24] sm:$0xff]  ;;  %p2181_p4 = pnand %p2180_p5, %p2857_p2  ;;  %s2183_s18 = sshll.u32 %s2268_s10, 4  ;;  %s2184_s18 = int_to_ptr.vmem [resolvable:$false] %s2183_s18 }
  0xee   : > { %1837 = vmatprep.subr.bf16.mxu0 %v1836_v11  ;;  %v447_v53 = vld [vmem:[%s2636_s26 + $0x18] sm:$0xff]  ;;  %v446_v57 = vld [vmem:[%s2636_s26 + $0x10] sm:$0xff]  ;;  %s2185_s22 = scalar_lea.vmem %s2184_s18, 1024  ;;  %p2186_p13 = scmp.lt.s32.totalorder %s2740_s1, %s2184_s18 }
  0xef   : > { %1749 = vmatmul.mubr.msk.f32.vlgmr.msra.gmra.mrb[0].mxu0 %vm450_vm0, %v441_v10  ;;  %p2182_p11 = pneg %p2181_p4  ;;  %p2187_p7 = scmp.lt.s32.totalorder %s2185_s22, %s2179_s13 }
  0xf0   : > { %1756 = vmatmul.mubr.msk.f32.vlgmr.msra.gmra.mrb[0].mxu1 %vm450_vm0, %v443_v13  ;;  %1839 = vmatpush3.bf16.msra.mxu0 %v1836_v11 }
  0xf1   : > { %1762 = vmatprep.mubr.msk.f32.mxu0 %vm450_vm0, %v613_v12  ;;  %1769 = vmatprep.mubr.msk.f32.mxu1 %vm450_vm0, %v2687_v15  ;;  %v706_v12 = vsub.f32 %v2687_v15, %v2691_v16  ;;  %p2188_p9 = por %p2187_p7, %p2186_p13 }
  0xf3   : > { %1763 = vmatmul.mubr.msk.f32.vlgmr.msra.gmra.mrb[2].mxu0 %vm450_vm0, %v614_v14  ;;  %p2189_p12 = pnand %p2188_p9, %p2182_p11 }
  0xf4   : > { %1776 = vmatprep.mubr.msk.f32.mxu0 %vm450_vm0, %v2691_v16 }
 0x1c2   : > { %v1750_v17 = vpop.f32.mrb[0].mxu0 }
 0x1c3   : > { %v1757_v18 = vpop.f32.mrb[0].mxu1  ;;  %v523_v19 = vpop.f32.mrb[1].mxu0 }
 0x1c4   : > { %v699_v20 = vsub.f32 %v1750_v17, %v1757_v18  ;;  %v604_v21 = vpop.f32.mrb[1].mxu1 }
 0x1c5   : > { %v698_v22 = vsub.f32 %v523_v19, %v604_v21 }
 0x1c6   : > { %v1764_v23 = vpop.f32.mrb[2].mxu0 }
 0x1c7   : > { %v1840_v24 = vpack.c.bf16 %v699_v20, %v698_v22  ;;  %v701_v25 = vsub.f32 %v1764_v23, %v1750_v17  ;;  %v689_v26 = vpop.f32.mrb[3].mxu0 }
 0x1c8   : > { %v700_v27 = vsub.f32 %v689_v26, %v523_v19 }
 0x1c9   : > { %v703_v28 = vsub.f32 %v701_v25, %v1757_v18  ;;  %1841 = vmatprep.subr.bf16.mxu1 %v1840_v24  ;;  %v707_v18 = vsub.f32 %v2695_v30, %v435_v35 }
 0x1ca   : > { %v702_v29 = vsub.f32 %v700_v27, %v604_v21  ;;  %1843 = vmatpush3.bf16.msra.mxu1 %v1840_v24 }
 0x1cb   : > { %v871_v32 = vadd.f32 %v703_v28, %v699_v20 }
 0x1cc   : > { %v870_v33 = vadd.f32 %v702_v29, %v698_v22  ;;  %v1844_v34 = vpack.c.bf16 %v703_v28, %v702_v29 }
 0x1cd   : > { %1770 = vmatmul.mubr.msk.f32.vlgmr.msra.gmra.mrb[2].mxu1 %vm450_vm0, %v2695_v30 }
 0x1ce   : > { %1845 = vmatprep.subr.bf16.mxu0 %v1844_v34  ;;  %v1848_v36 = vpack.c.bf16 %v871_v32, %v870_v33  ;;  %1783 = vmatprep.mubr.msk.f32.mxu1 %vm450_vm0, %v704_v31 }
 0x1cf   : > { %1847 = vmatpush3.bf16.msra.mxu0 %v1844_v34 }
 0x1d0   : > { %1849 = vmatprep.subr.bf16.mxu1 %v1848_v36 }
 0x1d1   : > { %1851 = vmatpush3.bf16.msra.mxu1 %v1848_v36 }
 0x1d2   : > { %1777 = vmatmul.mubr.msk.f32.vlgmr.msra.gmra.mrb[4].mxu0 %vm450_vm0, %v435_v35 }
 0x1d3   : > { %1790 = vmatprep.mubr.msk.f32.mxu0 %vm450_vm0, %v2687_v15  ;;  %v1374_v15 = vsub.f32 %v2653_v0, %v2657_v2 }
 0x1d4   : > { %1784 = vmatmul.mubr.msk.f32.vlgmr.msra.gmra.mrb[4].mxu1 %vm450_vm0, %v705_v37 }
 0x1d5   : > { %1797 = vmatprep.mubr.msk.f32.mxu1 %vm450_vm0, %v2691_v16  ;;  %v1375_v16 = vsub.f32 %v2655_v1, %v2663_v4 }
 0x1d7   : > { %v1872_v19 = vpack.c.bf16 %v1375_v16, %v1374_v15 }
 0x2a0   : > { %v1771_v38 = vpop.f32.mrb[2].mxu1 }
 0x2a1   : > { %v780_v39 = vpop.f32.mrb[3].mxu1 }
 0x2a5   : > { %v1778_v41 = vpop.f32.mrb[4].mxu0 }
 0x2a6   : > { %v954_v42 = vsub.f32 %v1771_v38, %v1778_v41  ;;  %v861_v44 = vpop.f32.mrb[5].mxu0 }
 0x2a7   : > { %v953_v46 = vsub.f32 %v780_v39, %v861_v44  ;;  %v1785_v47 = vpop.f32.mrb[4].mxu1 }
 0x2a8   : > { %v960_v48 = vsub.f32 %v445_v40, %v954_v42  ;;  %v956_v50 = vsub.f32 %v1785_v47, %v1771_v38  ;;  %v944_v51 = vpop.f32.mrb[5].mxu1 }
 0x2a9   : > { %v959_v52 = vsub.f32 %v444_v43, %v953_v46  ;;  %v955_v54 = vsub.f32 %v944_v51, %v780_v39 }
 0x2aa   : > { %v962_v55 = vmul.f32 %v960_v48, %v449_v45  ;;  %v958_v56 = vsub.f32 %v956_v50, %v1778_v41 }
 0x2ab   : > { %v961_v58 = vmul.f32 %v959_v52, %v448_v49  ;;  %v957_v59 = vsub.f32 %v955_v54, %v861_v44 }
 0x2ac   : > { %v964_v60 = vadd.f32 %v962_v55, %v954_v42  ;;  %v966_v61 = vsub.f32 %v447_v53, %v958_v56 }
 0x2ad   : > { %v963_v62 = vadd.f32 %v961_v58, %v953_v46  ;;  %v965_v63 = vsub.f32 %v446_v57, %v957_v59 }
 0x2ae   : > { %v968_v5 = vmul.f32 %v966_v61, %v449_v45 }
 0x2af   : > { %v967_v6 = vmul.f32 %v965_v63, %v448_v49  ;;  %v1852_v7 = vpack.c.bf16 %v964_v60, %v963_v62 }
 0x2b0   : > { %v970_v9 = vadd.f32 %v968_v5, %v958_v56 }
 0x2b1   : > { %v969_v10 = vadd.f32 %v967_v6, %v957_v59  ;;  %1853 = vmatprep.subr.bf16.mxu0 %v1852_v7 }
 0x2b2   : > { %1855 = vmatpush3.bf16.msra.mxu0 %v1852_v7  ;;  %v1122_v11 = vadd.f32 %v970_v9, %v964_v60 }
 0x2b3   : > { %v1856_v13 = vpack.c.bf16 %v970_v9, %v969_v10  ;;  %v1121_v14 = vadd.f32 %v969_v10, %v963_v62 }
 0x2b5   : > { %1857 = vmatprep.subr.bf16.mxu1 %v1856_v13  ;;  %1791 = vmatmul.mubr.msk.f32.vlgmr.msra.gmra.mrb[6].mxu0 %vm450_vm0, %v2695_v30  ;;  %v1860_v17 = vpack.c.bf16 %v1122_v11, %v1121_v14 }
 0x2b6   : > { %1859 = vmatpush3.bf16.msra.mxu1 %v1856_v13  ;;  %1804 = vmatprep.mubr.msk.f32.mxu0 %vm450_vm0, %v706_v12 }
 0x2b7   : > { %1861 = vmatprep.subr.bf16.mxu0 %v1860_v17  ;;  %1865 = vmatprep.subr.bf16.mxu1 %v2661_v3 }
 0x2b8   : > { %1863 = vmatpush3.bf16.msra.mxu0 %v1860_v17 }
 0x2b9   : > { %1798 = vmatmul.mubr.msk.f32.vlgmr.msra.gmra.mrb[6].mxu1 %vm450_vm0, %v435_v35  ;;  %1869 = vmatprep.subr.bf16.mxu0 %v2671_v8 }
 0x2ba   : > { %1867 = vmatpush3.bf16.msra.mxu1 %v2661_v3 }
 0x2bb   : > { %1805 = vmatmul.mubr.msk.f32.vlgmr.msra.gmra.mrb[8].mxu0 %vm450_vm0, %v707_v18  ;;  %1873 = vmatprep.subr.bf16.mxu1 %v1872_v19 }
 0x2bc   : > { %1871 = vmatpush3.bf16.msra.mxu0 %v2671_v8 }
 0x388   : > { %v1792_v20 = vpop.f32.mrb[6].mxu0 }
 0x389   : > { %v1037_v21 = vpop.f32.mrb[7].mxu0 }
 0x38c   : > { %v1799_v22 = vpop.f32.mrb[6].mxu1 }
 0x38d   : > { %v1205_v23 = vadd.f32 %v1799_v22, %v1792_v20  ;;  %v1112_v24 = vpop.f32.mrb[7].mxu1 }
 0x38e   : > { %v1204_v25 = vadd.f32 %v1112_v24, %v1037_v21  ;;  %v1806_v26 = vpop.f32.mrb[8].mxu0 }
 0x38f   : > { %v1207_v3 = vsub.f32 %v1806_v26, %v1792_v20  ;;  %v1195_v27 = vpop.f32.mrb[9].mxu0 }
 0x390   : > { %v1206_v28 = vsub.f32 %v1195_v27, %v1037_v21  ;;  %1811 = vmatprep.mubr.msk.f32.mxu1 %vm450_vm0, %v1204_v25 }
 0x391   : > { %v1209_v8 = vadd.f32 %v1799_v22, %v1207_v3  ;;  %1812 = vmatmul.mubr.msk.f32.vlgmr.msra.gmra.mrb[8].mxu1 %vm450_vm0, %v1205_v23 }
 0x392   : > { %v1208_v0 = vadd.f32 %v1206_v28, %v1112_v24  ;;  %1875 = vmatpush3.bf16.msra.mxu1 %v1872_v19 }
 0x393   : > { %v1373_v1 = vadd.f32 %v1209_v8, %v1205_v23 }
 0x394   : > { %v1372_v2 = vadd.f32 %v1208_v0, %v1204_v25  ;;  %1818 = vmatprep.mubr.msk.f32.mxu0 %vm450_vm0, %v1208_v0 }
 0x395   : > { %1819 = vmatmul.mubr.msk.f32.vlgmr.msra.gmra.mrb[10].mxu0 %vm450_vm0, %v1209_v8 }
 0x396   : > { %1825 = vmatprep.mubr.msk.f32.mxu1 %vm450_vm0, %v1372_v2 }
 0x397   : > { %1826 = vmatmul.mubr.msk.f32.vlgmr.msra.gmra.mrb[10].mxu1 %vm450_vm0, %v1373_v1 }
 0x464   : > { %v1813_v4 = vpop.f32.mrb[8].mxu1 }
 0x465   : > { %v1282_v29 = vpop.f32.mrb[9].mxu1 }
 0x468   : > { %v1820_v30 = vpop.f32.mrb[10].mxu0 }
 0x469   : > { %v1458_v31 = vadd.f32 %v1820_v30, %v1813_v4  ;;  %v1363_v32 = vpop.f32.mrb[11].mxu0 }
 0x46a   : > { %v1457_v33 = vadd.f32 %v1363_v32, %v1282_v29  ;;  %v1827_v34 = vpop.f32.mrb[10].mxu1 }
 0x46b   : > { %1464 = vst.msk [vmem:[%s431_s30 + $0x8] sm:$0xff] %vm450_vm0, %v1458_v31  ;;  %v1460_v35 = vsub.f32 %v1827_v34, %v1813_v4  ;;  %v1448_v36 = vpop.f32.mrb[11].mxu1 }
 0x46c   : > { %1463 = vst.msk [vmem:[%s431_s30] sm:$0xff] %vm450_vm0, %v1457_v33  ;;  %v1459_v37 = vsub.f32 %v1448_v36, %v1282_v29 }
 0x46d   : > { %v1462_v38 = vadd.f32 %v1820_v30, %v1460_v35 }
 0x46e   : > { %v1461_v39 = vadd.f32 %v1459_v37, %v1363_v32 }
 0x46f   : > { %1686 = vst.msk [vmem:[%s431_s30 + $0x18] sm:$0xff] %vm450_vm0, %v1462_v38 }
 0x470   : > { %1685 = vst.msk [vmem:[%s431_s30 + $0x10] sm:$0xff] %vm450_vm0, %v1461_v39 }
 0x471   : > { %2192 = shalt.err (!%p2189_p12)
}
 0x472   : > { %s2193_s17 = scalar_lea.hbm %s2746_s8, 512  ;;  %s2197_s16 = scalar_lea.hbm %s2799_s7, 1024 }
 0x473   : > { %p2194_p8 = scmp.ne.s32.totalorder %s2746_s8, %s2193_s17  ;;  %p2198_p1 = scmp.lt.u32.totalorder %s2746_s8, %s2799_s7 }
 0x474   : > { %p2199_p6 = scmp.lt.u32.totalorder %s2197_s16, %s2193_s17  ;;  %p2201_p5 = scmp.lt.u32.totalorder %s2193_s17, %s2746_s8 }
 0x475   : > { %p2195_p10 = pnand %p2194_p8, %p2857_p2 }
 0x476   : > { %p2200_p3 = por %p2199_p6, %p2198_p1 }
 0x477   : > { %p2196_p0 = pneg %p2195_p10 }
 0x478   : > { %p2202_p4 = por %p2201_p5, %p2200_p3 }
 0x47a   : > { %p2203_p11 = pnand %p2202_p4, %p2196_p0 }
 0x47c   : > { %2206 = shalt.err (!%p2203_p11)
}
 0x47d   : > { %s2269_s9 = smov 128   ;;  %s2270_s21 = smov 8  }
 0x47e   : > { %1898 = dma.vmem_to_hbm [thread:$0]  (%p2857_p2), %s2740_s1, 512, %s2746_s8, %s1469_s28, %s2269_s9, %s2269_s9, %s2270_s21  }
 0x47f PF: > { %s2858_s26 = sld [smem:[#allocation20_spill]]  ;;  %s2859_s14 = sld [smem:[#allocation22_spill]] }
 0x480   : > { %p2861_p7 = scmp.ge.s32.totalorder %s2257_s27, 2 }
 0x485   : > { %s1497_s24 = sand.u32 1, %s2858_s26   ;;  %p2860_p13 = scmp.ne.s32.totalorder %s2859_s14, 0 }
 0x486   : > { %s1498_s30 = scalar_lea.sflag [#allocation4], %s1497_s24 }
 0x487   : > { %p1924_p9 = pnand %p2861_p7, %p2860_p13 }
 0x489   : > { %2240 = dma.done.wait (!%p1924_p9), %s1498_s30, 512  }
 0x48a   : > { %2242 = vsyncadd (!%p1924_p9), %s1498_s30, 4294966784  ;;  %s2862_s27 = sld [smem:[#allocation23_spill]]  ;;  %s2863_s20 = sld [smem:[#allocation21_spill]] }
 0x48b   : > { %s2864_s26 = sld [smem:[#allocation24_spill]]  ;;  %s2865_s24 = smov %s2249_s25 }
 0x490   : > { %p25_p12 = scmp.ge.s32.totalorder %s2862_s27, 4   ;;  %s2866_s25 = smov %s2863_s20 }
 0x492   :  { %27 = sbr.rel (!%p25_p12) target bundleno = 13 (0xd), region = 134 }
 0x499   :  { %1503 = vsyncpa [#allocation3], 1 }
 0x49a   :  { %1505 = vsyncpa [#allocation3 + $0x1], 1 }
 0x49b   :  { %1506 = vsyncpa [#allocation6], 1 }
 0x49c   :  { %1508 = vsyncpa [#allocation6 + $0x1], 1 }
 0x49d   :  { %1509 = vsyncpa [#allocation9], 1 }
 0x49e   :  { %1510 = vsyncpa [#allocation12], 1 }
 0x49f   :  { %1511 = vsyncpa [#allocation4], 1 }
 0x4a0   :  { %1513 = vsyncpa [#allocation4 + $0x1], 1 }

// kernel: tpu_custom_call.1
= control target key start
LH: loop header
LB: loop body
LE: loop exit
PB: predicated region body
PF: predicated region fallthrough
CT: control target
= control target key end

     0   :  { %s2792_s0 = inlined_call_operand.hbm [shape: f32[2,2,16,16], index: 0, kind: input, shape index: {}]   ;;  %s2793_s1 = inlined_call_operand.hbm [shape: f32[2,2,16,16], index: 1, kind: input, shape index: {}]   ;;  %s2794_s2 = inlined_call_operand.hbm [shape: f32[2,1,16,16], index: 2, kind: input, shape index: {}]   ;;  %s2795_s3 = inlined_call_operand.hbm [shape: f32[16,16], index: 3, kind: input, shape index: {}]   ;;  %s2796_s4 = inlined_call_operand.hbm [shape: f32[16,16], index: 4, kind: input, shape index: {}]   ;;  %s2797_s5 = inlined_call_operand.hbm [shape: f32[16,16], index: 5, kind: input, shape index: {}]   ;;  %s2798_s6 = inlined_call_operand.hbm [shape: f32[16,16], index: 6, kind: input, shape index: {}]   ;;  %s2799_s7 = inlined_call_operand.hbm [shape: f32[2,2,16,16], index: 7, kind: output, shape index: {}]  }
   0x1   :  { %2823 = sst [smem:[#allocation25_spill]] %s2793_s1 }
   0x2   :  { %2824 = sst [smem:[#allocation26_spill]] %s2795_s3 }
   0x3   :  { %2825 = sst [smem:[#allocation27_spill]] %s2797_s5 }
   0x4   :  { %12 = vsyncpa [#allocation3], 0 }
   0x5   :  { %14 = vsyncpa [#allocation3 + $0x1], 0 }
   0x6   :  { %15 = vsyncpa [#allocation6], 0 }
   0x7   :  { %17 = vsyncpa [#allocation6 + $0x1], 0 }
   0x8   :  { %18 = vsyncpa [#allocation9], 0 }
   0x9   :  { %19 = vsyncpa [#allocation12], 0 }
   0xa   :  { %20 = vsyncpa [#allocation4], 0 }
   0xb   :  { %22 = vsyncpa [#allocation4 + $0x1], 0  ;;  %s2311_s24 = smov 0   ;;  %s2313_s25 = smov 0  }
   0xc   :  { %s2315_s26 = smov 0   ;;  %s2317_s27 = smov 0  }
   0xd LB: > { %2826 = sst [smem:[#allocation20_spill]] %s2245_s24  ;;  %s2332_s28 = sadd.s32 4294967295, %s2257_s27   ;;  %s2257_s27 = sphi %s2317_s27, %s2862_s27   ;;  %s2253_s26 = sphi %s2315_s26, %s2864_s26   ;;  %s2249_s25 = sphi %s2313_s25, %s2866_s25   ;;  %s2245_s24 = sphi %s2311_s24, %s2865_s24  }
   0xe   : > { %2827 = sst [smem:[#allocation21_spill]] %s2253_s26  ;;  %s1636_s29 = sadd.s32 4294967294, %s2257_s27  }
   0xf   : > { %p48_p0 = scmp.ne.s32.totalorder %s2249_s25, %s2245_s24  ;;  %p2800_p1 = scmp.eq.s32.totalorder %s2332_s28, 0 }
  0x10   : > { %p214_p3 = scmp.eq.s32.totalorder %s1636_s29, 1  ;;  %p1637_p5 = scmp.ge.s32.totalorder %s2257_s27, 1 }
  0x11   : > { %p2341_p4 = por %p2800_p1, %p48_p0  ;;  %p221_p7 = scmp.lt.s32.totalorder %s2257_s27, 3 }
  0x12   : > { %p2346_p6 = por %p214_p3, %p48_p0  ;;  %s2259_s10 = smov [#allocation8]  }
  0x13   : > { %s2828_s30 = scalar_select %p2341_p4, 1, 0 }
  0x14   : > { %s2829_s8 = scalar_select %p2346_p6, 1, 0 }
  0x15   : > { %p2351_p8 = pnand %p1637_p5, %p221_p7  ;;  %s233_s11 = sshll.u32 %s2259_s10, 4  ;;  %s2355_s11 = int_to_ptr.vmem [resolvable:$true] %s233_s11 }
  0x16   : > { %2830 = sst [smem:[#allocation22_spill]] %s2829_s8  ;;  %s2260_s13 = smov [#allocation11]  }
  0x17   : > { %s2831_s9 = scalar_select %p2351_p8, 1, 0 }
  0x18   : > { %p1900_p9 = pneg %p2351_p8  ;;  %s259_s14 = sshll.u32 %s2260_s13, 4  ;;  %s2366_s14 = int_to_ptr.vmem [resolvable:$true] %s259_s14 }
  0x19   : > { %s2833_s3 = sld [smem:[#allocation26_spill]] }
  0x1a   : > { %p2362_p11 = pnand %p1900_p9, %p2800_p1 }
  0x1c   : > { %s2832_s12 = scalar_select %p2362_p11, 1, 0 }
  0x1d   : > { %p2376_p13 = pneg %p2362_p11 }
  0x1f   : > { %s1977_s17 = scalar_lea.hbm %s2833_s3, 256 }
  0x20   : > { %p1978_p12 = scmp.ne.s32.totalorder %s2833_s3, %s1977_s17  ;;  %p1984_p5 = scmp.lt.u32.totalorder %s1977_s17, %s2833_s3 }
  0x21   : > { %s2834_s20 = scalar_select %p2376_p13, 1, 0 }
  0x22   : > { %p1980_p0 = pnand %p2376_p13, %p1978_p12 }
  0x24   : > { %p1981_p3 = pneg %p1980_p0 }
  0x26   : > { %p1986_p7 = pnand %p1984_p5, %p1981_p3 }
  0x28   : > { %1989 = shalt.err (!%p1986_p7)
}
  0x29   : > { %s1990_s23 = scalar_lea.vmem %s2355_s11, 256  ;;  %p1998_p2 = scmp.lt.s32.totalorder %s2355_s11, %s2355_s11 }
  0x2a   : > { %p1991_p9 = scmp.ne.s32.totalorder %s2355_s11, %s1990_s23  ;;  %p1999_p6 = scmp.lt.s32.totalorder %s1990_s23, %s1990_s23 }
  0x2c   : > { %p1993_p10 = pnand %p1991_p9, %p2376_p13  ;;  %p2000_p12 = por %p1999_p6, %p1998_p2 }
  0x2e   : > { %p1994_p1 = pneg %p1993_p10 }
  0x30   : > { %p2001_p0 = pnand %p2000_p12, %p1994_p1 }
  0x32   : > { %2004 = shalt.err (!%p2001_p0)
}
  0x33   : > { %s2801_s29 = smov 128   ;;  %s2803_s10 = smov 8  }
  0x34   : > { %1903 = dma.hbm_to_vmem [thread:$0]  (!%p2362_p11), %s2833_s3, 256, %s2355_s11, [#allocation9], %s2801_s29, %s2801_s29, %s2803_s10  }
  0x35   : > { %s2835_s5 = sld [smem:[#allocation27_spill]] }
  0x3b   : > { %s2005_s18 = scalar_lea.hbm %s2835_s5, 256 }
  0x3c   : > { %p2006_p1 = scmp.ne.s32.totalorder %s2835_s5, %s2005_s18  ;;  %p2012_p10 = scmp.lt.u32.totalorder %s2005_s18, %s2835_s5 }
  0x3e   : > { %p2008_p2 = pnand %p2006_p1, %p2376_p13 }
  0x40   : > { %p2009_p6 = pneg %p2008_p2 }
  0x42   : > { %p2014_p3 = pnand %p2012_p10, %p2009_p6 }
  0x44   : > { %2017 = shalt.err (!%p2014_p3)
}
  0x45   : > { %s2018_s11 = scalar_lea.vmem %s2366_s14, 256  ;;  %p2026_p12 = scmp.lt.s32.totalorder %s2366_s14, %s2366_s14 }
  0x46   : > { %p2019_p5 = scmp.ne.s32.totalorder %s2366_s14, %s2018_s11  ;;  %p2027_p0 = scmp.lt.s32.totalorder %s2018_s11, %s2018_s11 }
  0x48   : > { %p2021_p7 = pnand %p2019_p5, %p2376_p13  ;;  %p2028_p1 = por %p2027_p0, %p2026_p12 }
  0x4a   : > { %p2022_p9 = pneg %p2021_p7 }
  0x4c   : > { %p2029_p2 = pnand %p2028_p1, %p2022_p9 }
  0x4e   : > { %2032 = shalt.err (!%p2029_p2)
}
  0x4f   : > { %1909 = dma.hbm_to_vmem [thread:$0]  (!%p2362_p11), %s2835_s5, 256, %s2366_s14, [#allocation12], %s2801_s29, %s2801_s29, %s2803_s10  }
  0x50   : > { %s2427_s16 = sadd.s32 1, %s2257_s27   ;;  %s35_s17 = sadd.s32 1, %s2253_s26 }
  0x51   : > { %2836 = sst [smem:[#allocation23_spill]] %s2427_s16  ;;  %s32_s18 = ssub.s32 %s2257_s27, %s2427_s16 }
  0x52   : > { %p42_p6 = scmp.ne.s32.totalorder %s2253_s26, %s2249_s25  ;;  %p33_p10 = scmp.eq.s32.totalorder %s32_s18, 0 }
  0x53   : > { %p43_p3 = scmp.eq.s32.totalorder %s2257_s27, 0  ;;  %p2837_p5 = scmp.eq.s32.totalorder %s2332_s28, 1 }
  0x54   : > { %p1931_p9 = scmp.lt.s32.totalorder %s2257_s27, 2  ;;  %s2446_s22 = sand.u32 1, %s2253_s26  }
  0x55   : > { %p2437_p7 = por %p2837_p5, %p42_p6  ;;  %p44_p12 = por %p43_p3, %p42_p6 }
  0x56   : > { %s2443_s21 = scalar_select %p33_p10, %s2253_s26, %s35_s17  }
  0x57   : > { %s2838_s19 = scalar_select %p2437_p7, 1, 0 }
  0x58   : > { %2839 = sst [smem:[#allocation24_spill]] %s2443_s21  ;;  %s2806_s14 = sshll.u32 %s2446_s22, 5 }
  0x59   : > { %s2807_s23 = sshll.u32 %s2257_s27, 9  ;;  %p2450_p0 = pnand %p1931_p9, %p44_p12 }
  0x5a   : > { %s307_s13 = sand.u32 1, %s2257_s27   ;;  %s2841_s1 = sld [smem:[#allocation25_spill]] }
  0x5b   : > { %s2840_s11 = scalar_select %p2450_p0, 1, 0 }
  0x5c   : > { %s311_s17 = scalar_lea.vmem [#allocation5], %s2806_s14  ;;  %s2263_s3 = smov [#allocation10]  }
  0x5d   : > { %s318_s10 = sshll.u32 %s311_s17, 4  ;;  %s2466_s5 = sshll.u32 %s2263_s3, 4  ;;  %s2464_s10 = int_to_ptr.vmem [resolvable:$true] %s318_s10  ;;  %s247_s5 = int_to_ptr.vmem [resolvable:$true] %s2466_s5 }
  0x5e   : > { %s2468_s21 = scalar_lea.sflag [#allocation6], %s307_s13  ;;  %p2474_p2 = pneg %p2450_p0 }
  0x60   : > { %s2460_s29 = scalar_lea.hbm %s2841_s1, %s2807_s23  ;;  %s2038_s14 = scalar_lea.hbm %s2841_s1, 1024 }
  0x61   : > { %s2033_s26 = scalar_lea.hbm %s2460_s29, 512  ;;  %p2039_p3 = scmp.lt.u32.totalorder %s2460_s29, %s2841_s1 }
  0x62   : > { %p2034_p1 = scmp.ne.s32.totalorder %s2460_s29, %s2033_s26  ;;  %p2040_p5 = scmp.lt.u32.totalorder %s2038_s14, %s2033_s26 }
  0x63   : > { %s2842_s15 = scalar_select %p2474_p2, 1, 0 }
  0x64   : > { %p2036_p6 = pnand %p2474_p2, %p2034_p1  ;;  %p2041_p9 = por %p2040_p5, %p2039_p3 }
  0x65   : > { %p2042_p12 = scmp.lt.u32.totalorder %s2033_s26, %s2460_s29 }
  0x66   : > { %p2037_p10 = pneg %p2036_p6 }
  0x67   : > { %p2043_p7 = por %p2042_p12, %p2041_p9 }
  0x69   : > { %p2044_p4 = pnand %p2043_p7, %p2037_p10 }
  0x6b   : > { %2047 = shalt.err (!%p2044_p4)
}
  0x6c   : > { %s2048_s13 = scalar_lea.vmem %s2464_s10, 512  ;;  %s2264_s18 = smov [#allocation5]  }
  0x6d   : > { %p2049_p1 = scmp.ne.s32.totalorder %s2464_s10, %s2048_s13  ;;  %s2053_s17 = sshll.u32 %s2264_s18, 4  ;;  %s2054_s17 = int_to_ptr.vmem [resolvable:$false] %s2053_s17 }
  0x6e   : > { %s2055_s23 = scalar_lea.vmem %s2054_s17, 1024  ;;  %p2056_p11 = scmp.lt.s32.totalorder %s2464_s10, %s2054_s17 }
  0x6f   : > { %p2051_p6 = pnand %p2049_p1, %p2474_p2  ;;  %p2057_p13 = scmp.lt.s32.totalorder %s2055_s23, %s2048_s13 }
  0x71   : > { %p2052_p8 = pneg %p2051_p6  ;;  %p2058_p3 = por %p2057_p13, %p2056_p11 }
  0x73   : > { %p2059_p5 = pnand %p2058_p3, %p2052_p8 }
  0x75   : > { %2062 = shalt.err (!%p2059_p5)
}
  0x76   : > { %s2843_s26 = smov 8   ;;  %s2844_s14 = smov 128  }
  0x77   : > { %1919 = dma.hbm_to_vmem [thread:$0]  (!%p2450_p0), %s2460_s29, 512, %s2464_s10, %s2468_s21, %s2844_s14, %s2844_s14, %s2843_s26  }
  0x78   : > { %s2063_s17 = scalar_lea.hbm %s2796_s4, 256  ;;  %p2845_p8 = scmp.ne.s32.totalorder %s2834_s20, 0 }
  0x79   : > { %p2064_p4 = scmp.ne.s32.totalorder %s2796_s4, %s2063_s17  ;;  %p2070_p7 = scmp.lt.u32.totalorder %s2063_s17, %s2796_s4 }
  0x7b   : > { %p2066_p11 = pnand %p2064_p4, %p2845_p8 }
  0x7d   : > { %p2067_p13 = pneg %p2066_p11 }
  0x7f   : > { %p2072_p10 = pnand %p2070_p7, %p2067_p13 }
  0x81   : > { %2075 = shalt.err (!%p2072_p10)
}
  0x82   : > { %s2076_s8 = scalar_lea.vmem %s247_s5, 256  ;;  %p2084_p6 = scmp.lt.s32.totalorder %s247_s5, %s247_s5 }
  0x83   : > { %p2077_p9 = scmp.ne.s32.totalorder %s247_s5, %s2076_s8  ;;  %p2085_p3 = scmp.lt.s32.totalorder %s2076_s8, %s2076_s8 }
  0x85   : > { %p2079_p12 = pnand %p2077_p9, %p2845_p8  ;;  %p2086_p5 = por %p2085_p3, %p2084_p6 }
  0x87   : > { %p2080_p1 = pneg %p2079_p12 }
  0x89   : > { %p2087_p0 = pnand %p2086_p5, %p2080_p1 }
  0x8b   : > { %2090 = shalt.err (!%p2087_p0)
}
  0x8c   : > { %p2846_p4 = scmp.ne.s32.totalorder %s2832_s12, 0  ;;  %s2265_s10 = smov [#allocation13]  }
  0x8d   : > { %s272_s16 = sshll.u32 %s2265_s10, 4  ;;  %s2091_s8 = scalar_lea.hbm %s2798_s6, 256  ;;  %s273_s16 = int_to_ptr.vmem [resolvable:$true] %s272_s16 }
  0x8e   : > { %1906 = dma.hbm_to_vmem [thread:$0]  (!%p2846_p4), %s2796_s4, 256, %s247_s5, [#allocation9], %s2844_s14, %s2844_s14, %s2843_s26  }
  0x8f   : > { %p2092_p0 = scmp.ne.s32.totalorder %s2798_s6, %s2091_s8  ;;  %p2098_p7 = scmp.lt.u32.totalorder %s2091_s8, %s2798_s6 }
  0x91   : > { %p2094_p11 = pnand %p2092_p0, %p2845_p8 }
  0x93   : > { %p2095_p13 = pneg %p2094_p11 }
  0x95   : > { %p2100_p10 = pnand %p2098_p7, %p2095_p13 }
  0x97   : > { %2103 = shalt.err (!%p2100_p10)
}
  0x98   : > { %s2104_s5 = scalar_lea.vmem %s273_s16, 256  ;;  %p2112_p6 = scmp.lt.s32.totalorder %s273_s16, %s273_s16 }
  0x99   : > { %p2105_p9 = scmp.ne.s32.totalorder %s273_s16, %s2104_s5  ;;  %p2113_p3 = scmp.lt.s32.totalorder %s2104_s5, %s2104_s5 }
  0x9b   : > { %p2107_p12 = pnand %p2105_p9, %p2845_p8  ;;  %p2114_p5 = por %p2113_p3, %p2112_p6 }
  0x9d   : > { %p2108_p1 = pneg %p2107_p12 }
  0x9f   : > { %p2115_p2 = pnand %p2114_p5, %p2108_p1 }
  0xa1   : > { %2118 = shalt.err (!%p2115_p2)
}
  0xa2   : > { %1912 = dma.hbm_to_vmem [thread:$0]  (!%p2846_p4), %s2798_s6, 256, %s273_s16, [#allocation12], %s2844_s14, %s2844_s14, %s2843_s26  }
  0xa3   : > { %s2847_s20 = sshll.u32 %s2257_s27, 9  ;;  %s2848_s18 = sshll.u32 %s2446_s22, 5 }
  0xa4   : > { %s2549_s3 = scalar_lea.hbm %s2792_s0, %s2847_s20  ;;  %s290_s12 = scalar_lea.vmem [#allocation2], %s2848_s18 }
  0xa5   : > { %s297_s8 = sshll.u32 %s290_s12, 4  ;;  %s1649_s17 = sshll.u32 %s2446_s22, 4  ;;  %s2553_s8 = int_to_ptr.vmem [resolvable:$true] %s297_s8 }
  0xa6   : > { %s287_s13 = scalar_lea.sflag [#allocation3], %s2446_s22  ;;  %s2119_s23 = scalar_lea.hbm %s2549_s3, 512 }
  0xa7   : > { %p2120_p2 = scmp.ne.s32.totalorder %s2549_s3, %s2119_s23  ;;  %p2849_p8 = scmp.ne.s32.totalorder %s2842_s15, 0 }
  0xa8   : > { %s2124_s24 = scalar_lea.hbm %s2792_s0, 1024  ;;  %p2125_p11 = scmp.lt.u32.totalorder %s2549_s3, %s2792_s0 }
  0xa9   : > { %p2122_p4 = pnand %p2120_p2, %p2849_p8  ;;  %p2126_p13 = scmp.lt.u32.totalorder %s2124_s24, %s2119_s23 }
  0xaa   : > { %p2128_p10 = scmp.lt.u32.totalorder %s2119_s23, %s2549_s3 }
  0xab   : > { %p2123_p0 = pneg %p2122_p4  ;;  %p2127_p7 = por %p2126_p13, %p2125_p11 }
  0xad   : > { %p2129_p9 = por %p2128_p10, %p2127_p7 }
  0xaf   : > { %p2130_p12 = pnand %p2129_p9, %p2123_p0 }
  0xb1   : > { %2133 = shalt.err (!%p2130_p12)
}
  0xb2   : > { %s2134_s29 = scalar_lea.vmem %s2553_s8, 512  ;;  %s2266_s10 = smov [#allocation2]  }
  0xb3   : > { %p2135_p1 = scmp.ne.s32.totalorder %s2553_s8, %s2134_s29  ;;  %s2139_s18 = sshll.u32 %s2266_s10, 4  ;;  %s2140_s18 = int_to_ptr.vmem [resolvable:$false] %s2139_s18 }
  0xb4   : > { %s2141_s12 = scalar_lea.vmem %s2140_s18, 1024  ;;  %p2142_p5 = scmp.lt.s32.totalorder %s2553_s8, %s2140_s18 }
  0xb5   : > { %p2137_p6 = pnand %p2135_p1, %p2849_p8  ;;  %p2143_p2 = scmp.lt.s32.totalorder %s2141_s12, %s2134_s29 }
  0xb7   : > { %p2138_p3 = pneg %p2137_p6  ;;  %p2144_p4 = por %p2143_p2, %p2142_p5 }
  0xb9   : > { %p2145_p11 = pnand %p2144_p4, %p2138_p3 }
  0xbb   : > { %2148 = shalt.err (!%p2145_p11)
}
  0xbc   : > { %p2850_p0 = scmp.ne.s32.totalorder %s2840_s11, 0  ;;  %s1694_s23 = sshll.u32 %s2257_s27, 8 }
  0xbd   : > { %s2587_s24 = scalar_lea.hbm %s2794_s2, %s1694_s23  ;;  %s332_s1 = scalar_lea.vmem [#allocation7], %s1649_s17 }
  0xbe   : > { %1916 = dma.hbm_to_vmem [thread:$0]  (!%p2850_p0), %s2549_s3, 512, %s2553_s8, %s287_s13, %s2844_s14, %s2844_s14, %s2843_s26  }
  0xbf   : > { %s339_s20 = sshll.u32 %s332_s1, 4  ;;  %s2149_s29 = scalar_lea.hbm %s2587_s24, 256  ;;  %s2591_s20 = int_to_ptr.vmem [resolvable:$true] %s339_s20 }
  0xc0   : > { %p2150_p13 = scmp.ne.s32.totalorder %s2587_s24, %s2149_s29  ;;  %s2154_s13 = scalar_lea.hbm %s2794_s2, 512 }
  0xc1   : > { %p2155_p9 = scmp.lt.u32.totalorder %s2587_s24, %s2794_s2  ;;  %p2156_p12 = scmp.lt.u32.totalorder %s2154_s13, %s2149_s29 }
  0xc2   : > { %p2152_p7 = pnand %p2150_p13, %p2849_p8  ;;  %p2158_p6 = scmp.lt.u32.totalorder %s2149_s29, %s2587_s24 }
  0xc3   : > { %p2157_p1 = por %p2156_p12, %p2155_p9 }
  0xc4   : > { %p2153_p10 = pneg %p2152_p7 }
  0xc5   : > { %p2159_p3 = por %p2158_p6, %p2157_p1 }
  0xc7   : > { %p2160_p5 = pnand %p2159_p3, %p2153_p10 }
  0xc9   : > { %2163 = shalt.err (!%p2160_p5)
}
  0xca   : > { %s2164_s22 = scalar_lea.vmem %s2591_s20, 256  ;;  %s2267_s17 = smov [#allocation7]  }
  0xcb   : > { %p2165_p2 = scmp.ne.s32.totalorder %s2591_s20, %s2164_s22  ;;  %s2169_s12 = sshll.u32 %s2267_s17, 4  ;;  %s2170_s12 = int_to_ptr.vmem [resolvable:$false] %s2169_s12 }
  0xcc   : > { %s2171_s23 = scalar_lea.vmem %s2170_s12, 512  ;;  %p2172_p13 = scmp.lt.s32.totalorder %s2591_s20, %s2170_s12 }
  0xcd   : > { %p2167_p4 = pnand %p2165_p2, %p2849_p8  ;;  %p2173_p7 = scmp.lt.s32.totalorder %s2171_s23, %s2164_s22 }
  0xcf   : > { %p2168_p11 = pneg %p2167_p4  ;;  %p2174_p9 = por %p2173_p7, %p2172_p13 }
  0xd1   : > { %p2175_p12 = pnand %p2174_p9, %p2168_p11 }
  0xd3   : > { %2178 = shalt.err (!%p2175_p12)
}
  0xd4   : > { %1922 = dma.hbm_to_vmem [thread:$0]  (!%p2850_p0), %s2587_s24, 256, %s2591_s20, %s2468_s21, %s2844_s14, %s2844_s14, %s2843_s26  }
  0xd5   : > { %p2851_p8 = scmp.ne.s32.totalorder %s2831_s9, 0 }
  0xd6   : > { %s2621_s15 = sand.u32 (!%p2851_p8), 1, %s2249_s25   ;;  %p2852_p10 = scmp.ne.s32.totalorder (!%p2851_p8), %s2828_s30, 0 }
  0xd7   : > { %351 = sbr.rel (%p2851_p8) target bundleno = 1151 (0x47f), region = 48  ;;  %s2624_s16 = sshll.u32 (!%p2851_p8), %s2621_s15, 5 }
  0xd8   : > { %s354_s11 = scalar_lea.sflag (!%p2851_p8), [#allocation3], %s2621_s15  ;;  %s2628_s5 = scalar_lea.vmem (!%p2851_p8), [#allocation2], %s2624_s16 }
  0xde   : > { %2224 = dma.done.wait (%p2852_p10), %s354_s11, 512  }
  0xdf   : > { %2226 = vsyncadd (%p2852_p10), %s354_s11, 4294966784  ;;  %s362_s9 = sand.u32 1, %s2332_s28   ;;  %s2636_s26 = scalar_lea.vmem [#allocation5], %s2624_s16 }
  0xe0   : > { %s363_s21 = scalar_lea.sflag [#allocation6], %s362_s9 }
  0xe1   : > { %2228 = dma.done.wait (%p2852_p10), %s363_s21, 768  }
  0xe2   : > { %2230 = vsyncadd (%p2852_p10), %s363_s21, 4294966528  ;;  %s1655_s14 = sshll.u32 %s2621_s15, 4  ;;  %p2853_p0 = scmp.eq.s32.totalorder %s2332_s28, 0 }
  0xe3   : > { %s2643_s24 = scalar_lea.vmem [#allocation7], %s1655_s14 }
  0xe4   : > { %2232 = dma.done.wait (%p2853_p0), [#allocation9], 512   ;;  %p2854_p1 = pmov %p2853_p0 }
  0xe5   : > { %p2855_p6 = pmov %p2853_p0 }
  0xe6   : > { %2234 = vsyncadd (%p2854_p1), [#allocation9], 4294966784 }
  0xe7   : > { %2236 = dma.done.wait (%p2855_p6), [#allocation12], 512   ;;  %p2856_p3 = pmov %p2853_p0 }
  0xe8   : > { %vm450_vm0 = vcmask 130048   ;;  %v2653_v0 = vld [vmem:[#allocation11] sm:$0xff]  ;;  %v2655_v1 = vld [vmem:[#allocation11 + $0x8] sm:$0xff]  ;;  %v2657_v2 = vld [vmem:[#allocation13] sm:$0xff]  ;;  %s431_s30 = scalar_lea.vmem [#allocation14], %s2624_s16  ;;  %s1695_s20 = sshll.u32 %s2332_s28, 9 }
  0xe9   : > { %2238 = vsyncadd (%p2856_p3), [#allocation12], 4294966784  ;;  %v2661_v3 = vpack.c.bf16 %v2655_v1, %v2653_v0  ;;  %v2663_v4 = vld [vmem:[#allocation13 + $0x8] sm:$0xff]  ;;  %v440_v5 = vld [vmem:[%s2628_s5] sm:$0xff]  ;;  %v615_v7 = vadd.f32 %v2657_v2, %v2653_v0  ;;  %s1482_s1 = sshll.u32 %s431_s30, 4  ;;  %s2746_s8 = scalar_lea.hbm %s2799_s7, %s1695_s20  ;;  %s2740_s1 = int_to_ptr.vmem [resolvable:$true] %s1482_s1 }
  0xea   : > { %v442_v6 = vld [vmem:[%s2628_s5 + $0x10] sm:$0xff]  ;;  %v2671_v8 = vpack.c.bf16 %v2663_v4, %v2657_v2  ;;  %1748 = vmatprep.mubr.msk.f32.mxu0 %vm450_vm0, %v440_v5  ;;  %v616_v9 = vadd.f32 %v2663_v4, %v2655_v1  ;;  %v441_v10 = vld [vmem:[%s2628_s5 + $0x8] sm:$0xff]  ;;  %v443_v13 = vld [vmem:[%s2628_s5 + $0x18] sm:$0xff]  ;;  %s1469_s28 = scalar_lea.sflag [#allocation4], %s2621_s15  ;;  %s2179_s13 = scalar_lea.vmem %s2740_s1, 512 }
  0xeb   : > { %1755 = vmatprep.mubr.msk.f32.mxu1 %vm450_vm0, %v442_v6  ;;  %1829 = vmatprep.subr.bf16.mxu0 %v2661_v3  ;;  %v613_v12 = vadd.f32 %v442_v6, %v440_v5  ;;  %v614_v14 = vadd.f32 %v443_v13, %v441_v10  ;;  %v2687_v15 = vld [vmem:[#allocation8] sm:$0xff]  ;;  %v2691_v16 = vld [vmem:[#allocation10] sm:$0xff]  ;;  %v2695_v30 = vld [vmem:[#allocation8 + $0x8] sm:$0xff]  ;;  %p2180_p5 = scmp.ne.s32.totalorder %s2740_s1, %s2179_s13  ;;  %p2857_p2 = scmp.ne.s32.totalorder %s2838_s19, 0 }
  0xec   : > { %1833 = vmatprep.subr.bf16.mxu1 %v2671_v8  ;;  %1831 = vmatpush3.bf16.msra.mxu0 %v2661_v3  ;;  %v1836_v11 = vpack.c.bf16 %v616_v9, %v615_v7  ;;  %v704_v31 = vadd.f32 %v2691_v16, %v2687_v15  ;;  %v435_v35 = vld [vmem:[#allocation10 + $0x8] sm:$0xff]  ;;  %v445_v40 = vld [vmem:[%s2636_s26 + $0x8] sm:$0xff]  ;;  %v444_v43 = vld [vmem:[%s2636_s26] sm:$0xff]  ;;  %s2268_s10 = smov [#allocation14]  }
  0xed   : > { %1835 = vmatpush3.bf16.msra.mxu1 %v2671_v8  ;;  %v705_v37 = vadd.f32 %v435_v35, %v2695_v30  ;;  %v449_v45 = vld [vmem:[%s2643_s24 + $0x8] sm:$0xff]  ;;  %v448_v49 = vld [vmem:[%s2643_s24] sm:$0xff]  ;;  %p2181_p4 = pnand %p2180_p5, %p2857_p2  ;;  %s2183_s18 = sshll.u32 %s2268_s10, 4  ;;  %s2184_s18 = int_to_ptr.vmem [resolvable:$false] %s2183_s18 }
  0xee   : > { %1837 = vmatprep.subr.bf16.mxu0 %v1836_v11  ;;  %v447_v53 = vld [vmem:[%s2636_s26 + $0x18] sm:$0xff]  ;;  %v446_v57 = vld [vmem:[%s2636_s26 + $0x10] sm:$0xff]  ;;  %s2185_s22 = scalar_lea.vmem %s2184_s18, 1024  ;;  %p2186_p13 = scmp.lt.s32.totalorder %s2740_s1, %s2184_s18 }
  0xef   : > { %1749 = vmatmul.mubr.msk.f32.vlgmr.msra.gmra.mrb[0].mxu0 %vm450_vm0, %v441_v10  ;;  %p2182_p11 = pneg %p2181_p4  ;;  %p2187_p7 = scmp.lt.s32.totalorder %s2185_s22, %s2179_s13 }
  0xf0   : > { %1756 = vmatmul.mubr.msk.f32.vlgmr.msra.gmra.mrb[0].mxu1 %vm450_vm0, %v443_v13  ;;  %1839 = vmatpush3.bf16.msra.mxu0 %v1836_v11 }
  0xf1   : > { %1762 = vmatprep.mubr.msk.f32.mxu0 %vm450_vm0, %v613_v12  ;;  %1769 = vmatprep.mubr.msk.f32.mxu1 %vm450_vm0, %v2687_v15  ;;  %v706_v12 = vsub.f32 %v2687_v15, %v2691_v16  ;;  %p2188_p9 = por %p2187_p7, %p2186_p13 }
  0xf3   : > { %1763 = vmatmul.mubr.msk.f32.vlgmr.msra.gmra.mrb[2].mxu0 %vm450_vm0, %v614_v14  ;;  %p2189_p12 = pnand %p2188_p9, %p2182_p11 }
  0xf4   : > { %1776 = vmatprep.mubr.msk.f32.mxu0 %vm450_vm0, %v2691_v16 }
 0x1c2   : > { %v1750_v17 = vpop.f32.mrb[0].mxu0 }
 0x1c3   : > { %v1757_v18 = vpop.f32.mrb[0].mxu1  ;;  %v523_v19 = vpop.f32.mrb[1].mxu0 }
 0x1c4   : > { %v699_v20 = vsub.f32 %v1750_v17, %v1757_v18  ;;  %v604_v21 = vpop.f32.mrb[1].mxu1 }
 0x1c5   : > { %v698_v22 = vsub.f32 %v523_v19, %v604_v21 }
 0x1c6   : > { %v1764_v23 = vpop.f32.mrb[2].mxu0 }
 0x1c7   : > { %v1840_v24 = vpack.c.bf16 %v699_v20, %v698_v22  ;;  %v701_v25 = vsub.f32 %v1764_v23, %v1750_v17  ;;  %v689_v26 = vpop.f32.mrb[3].mxu0 }
 0x1c8   : > { %v700_v27 = vsub.f32 %v689_v26, %v523_v19 }
 0x1c9   : > { %v703_v28 = vsub.f32 %v701_v25, %v1757_v18  ;;  %1841 = vmatprep.subr.bf16.mxu1 %v1840_v24  ;;  %v707_v18 = vsub.f32 %v2695_v30, %v435_v35 }
 0x1ca   : > { %v702_v29 = vsub.f32 %v700_v27, %v604_v21  ;;  %1843 = vmatpush3.bf16.msra.mxu1 %v1840_v24 }
 0x1cb   : > { %v871_v32 = vadd.f32 %v703_v28, %v699_v20 }
 0x1cc   : > { %v870_v33 = vadd.f32 %v702_v29, %v698_v22  ;;  %v1844_v34 = vpack.c.bf16 %v703_v28, %v702_v29 }
 0x1cd   : > { %1770 = vmatmul.mubr.msk.f32.vlgmr.msra.gmra.mrb[2].mxu1 %vm450_vm0, %v2695_v30 }
 0x1ce   : > { %1845 = vmatprep.subr.bf16.mxu0 %v1844_v34  ;;  %v1848_v36 = vpack.c.bf16 %v871_v32, %v870_v33  ;;  %1783 = vmatprep.mubr.msk.f32.mxu1 %vm450_vm0, %v704_v31 }
 0x1cf   : > { %1847 = vmatpush3.bf16.msra.mxu0 %v1844_v34 }
 0x1d0   : > { %1849 = vmatprep.subr.bf16.mxu1 %v1848_v36 }
 0x1d1   : > { %1851 = vmatpush3.bf16.msra.mxu1 %v1848_v36 }
 0x1d2   : > { %1777 = vmatmul.mubr.msk.f32.vlgmr.msra.gmra.mrb[4].mxu0 %vm450_vm0, %v435_v35 }
 0x1d3   : > { %1790 = vmatprep.mubr.msk.f32.mxu0 %vm450_vm0, %v2687_v15  ;;  %v1374_v15 = vsub.f32 %v2653_v0, %v2657_v2 }
 0x1d4   : > { %1784 = vmatmul.mubr.msk.f32.vlgmr.msra.gmra.mrb[4].mxu1 %vm450_vm0, %v705_v37 }
 0x1d5   : > { %1797 = vmatprep.mubr.msk.f32.mxu1 %vm450_vm0, %v2691_v16  ;;  %v1375_v16 = vsub.f32 %v2655_v1, %v2663_v4 }
 0x1d7   : > { %v1872_v19 = vpack.c.bf16 %v1375_v16, %v1374_v15 }
 0x2a0   : > { %v1771_v38 = vpop.f32.mrb[2].mxu1 }
 0x2a1   : > { %v780_v39 = vpop.f32.mrb[3].mxu1 }
 0x2a5   : > { %v1778_v41 = vpop.f32.mrb[4].mxu0 }
 0x2a6   : > { %v954_v42 = vsub.f32 %v1771_v38, %v1778_v41  ;;  %v861_v44 = vpop.f32.mrb[5].mxu0 }
 0x2a7   : > { %v953_v46 = vsub.f32 %v780_v39, %v861_v44  ;;  %v1785_v47 = vpop.f32.mrb[4].mxu1 }
 0x2a8   : > { %v960_v48 = vsub.f32 %v445_v40, %v954_v42  ;;  %v956_v50 = vsub.f32 %v1785_v47, %v1771_v38  ;;  %v944_v51 = vpop.f32.mrb[5].mxu1 }
 0x2a9   : > { %v959_v52 = vsub.f32 %v444_v43, %v953_v46  ;;  %v955_v54 = vsub.f32 %v944_v51, %v780_v39 }
 0x2aa   : > { %v962_v55 = vmul.f32 %v960_v48, %v449_v45  ;;  %v958_v56 = vsub.f32 %v956_v50, %v1778_v41 }
 0x2ab   : > { %v961_v58 = vmul.f32 %v959_v52, %v448_v49  ;;  %v957_v59 = vsub.f32 %v955_v54, %v861_v44 }
 0x2ac   : > { %v964_v60 = vadd.f32 %v962_v55, %v954_v42  ;;  %v966_v61 = vsub.f32 %v447_v53, %v958_v56 }
 0x2ad   : > { %v963_v62 = vadd.f32 %v961_v58, %v953_v46  ;;  %v965_v63 = vsub.f32 %v446_v57, %v957_v59 }
 0x2ae   : > { %v968_v5 = vmul.f32 %v966_v61, %v449_v45 }
 0x2af   : > { %v967_v6 = vmul.f32 %v965_v63, %v448_v49  ;;  %v1852_v7 = vpack.c.bf16 %v964_v60, %v963_v62 }
 0x2b0   : > { %v970_v9 = vadd.f32 %v968_v5, %v958_v56 }
 0x2b1   : > { %v969_v10 = vadd.f32 %v967_v6, %v957_v59  ;;  %1853 = vmatprep.subr.bf16.mxu0 %v1852_v7 }
 0x2b2   : > { %1855 = vmatpush3.bf16.msra.mxu0 %v1852_v7  ;;  %v1122_v11 = vadd.f32 %v970_v9, %v964_v60 }
 0x2b3   : > { %v1856_v13 = vpack.c.bf16 %v970_v9, %v969_v10  ;;  %v1121_v14 = vadd.f32 %v969_v10, %v963_v62 }
 0x2b5   : > { %1857 = vmatprep.subr.bf16.mxu1 %v1856_v13  ;;  %1791 = vmatmul.mubr.msk.f32.vlgmr.msra.gmra.mrb[6].mxu0 %vm450_vm0, %v2695_v30  ;;  %v1860_v17 = vpack.c.bf16 %v1122_v11, %v1121_v14 }
 0x2b6   : > { %1859 = vmatpush3.bf16.msra.mxu1 %v1856_v13  ;;  %1804 = vmatprep.mubr.msk.f32.mxu0 %vm450_vm0, %v706_v12 }
 0x2b7   : > { %1861 = vmatprep.subr.bf16.mxu0 %v1860_v17  ;;  %1865 = vmatprep.subr.bf16.mxu1 %v2661_v3 }
 0x2b8   : > { %1863 = vmatpush3.bf16.msra.mxu0 %v1860_v17 }
 0x2b9   : > { %1798 = vmatmul.mubr.msk.f32.vlgmr.msra.gmra.mrb[6].mxu1 %vm450_vm0, %v435_v35  ;;  %1869 = vmatprep.subr.bf16.mxu0 %v2671_v8 }
 0x2ba   : > { %1867 = vmatpush3.bf16.msra.mxu1 %v2661_v3 }
 0x2bb   : > { %1805 = vmatmul.mubr.msk.f32.vlgmr.msra.gmra.mrb[8].mxu0 %vm450_vm0, %v707_v18  ;;  %1873 = vmatprep.subr.bf16.mxu1 %v1872_v19 }
 0x2bc   : > { %1871 = vmatpush3.bf16.msra.mxu0 %v2671_v8 }
 0x388   : > { %v1792_v20 = vpop.f32.mrb[6].mxu0 }
 0x389   : > { %v1037_v21 = vpop.f32.mrb[7].mxu0 }
 0x38c   : > { %v1799_v22 = vpop.f32.mrb[6].mxu1 }
 0x38d   : > { %v1205_v23 = vadd.f32 %v1799_v22, %v1792_v20  ;;  %v1112_v24 = vpop.f32.mrb[7].mxu1 }
 0x38e   : > { %v1204_v25 = vadd.f32 %v1112_v24, %v1037_v21  ;;  %v1806_v26 = vpop.f32.mrb[8].mxu0 }
 0x38f   : > { %v1207_v3 = vsub.f32 %v1806_v26, %v1792_v20  ;;  %v1195_v27 = vpop.f32.mrb[9].mxu0 }
 0x390   : > { %v1206_v28 = vsub.f32 %v1195_v27, %v1037_v21  ;;  %1811 = vmatprep.mubr.msk.f32.mxu1 %vm450_vm0, %v1204_v25 }
 0x391   : > { %v1209_v8 = vadd.f32 %v1799_v22, %v1207_v3  ;;  %1812 = vmatmul.mubr.msk.f32.vlgmr.msra.gmra.mrb[8].mxu1 %vm450_vm0, %v1205_v23 }
 0x392   : > { %v1208_v0 = vadd.f32 %v1206_v28, %v1112_v24  ;;  %1875 = vmatpush3.bf16.msra.mxu1 %v1872_v19 }
 0x393   : > { %v1373_v1 = vadd.f32 %v1209_v8, %v1205_v23 }
 0x394   : > { %v1372_v2 = vadd.f32 %v1208_v0, %v1204_v25  ;;  %1818 = vmatprep.mubr.msk.f32.mxu0 %vm450_vm0, %v1208_v0 }
 0x395   : > { %1819 = vmatmul.mubr.msk.f32.vlgmr.msra.gmra.mrb[10].mxu0 %vm450_vm0, %v1209_v8 }
 0x396   : > { %1825 = vmatprep.mubr.msk.f32.mxu1 %vm450_vm0, %v1372_v2 }
 0x397   : > { %1826 = vmatmul.mubr.msk.f32.vlgmr.msra.gmra.mrb[10].mxu1 %vm450_vm0, %v1373_v1 }
 0x464   : > { %v1813_v4 = vpop.f32.mrb[8].mxu1 }
 0x465   : > { %v1282_v29 = vpop.f32.mrb[9].mxu1 }
 0x468   : > { %v1820_v30 = vpop.f32.mrb[10].mxu0 }
 0x469   : > { %v1458_v31 = vadd.f32 %v1820_v30, %v1813_v4  ;;  %v1363_v32 = vpop.f32.mrb[11].mxu0 }
 0x46a   : > { %v1457_v33 = vadd.f32 %v1363_v32, %v1282_v29  ;;  %v1827_v34 = vpop.f32.mrb[10].mxu1 }
 0x46b   : > { %1464 = vst.msk [vmem:[%s431_s30 + $0x8] sm:$0xff] %vm450_vm0, %v1458_v31  ;;  %v1460_v35 = vsub.f32 %v1827_v34, %v1813_v4  ;;  %v1448_v36 = vpop.f32.mrb[11].mxu1 }
 0x46c   : > { %1463 = vst.msk [vmem:[%s431_s30] sm:$0xff] %vm450_vm0, %v1457_v33  ;;  %v1459_v37 = vsub.f32 %v1448_v36, %v1282_v29 }
 0x46d   : > { %v1462_v38 = vadd.f32 %v1820_v30, %v1460_v35 }
 0x46e   : > { %v1461_v39 = vadd.f32 %v1459_v37, %v1363_v32 }
 0x46f   : > { %1686 = vst.msk [vmem:[%s431_s30 + $0x18] sm:$0xff] %vm450_vm0, %v1462_v38 }
 0x470   : > { %1685 = vst.msk [vmem:[%s431_s30 + $0x10] sm:$0xff] %vm450_vm0, %v1461_v39 }
 0x471   : > { %2192 = shalt.err (!%p2189_p12)
}
 0x472   : > { %s2193_s17 = scalar_lea.hbm %s2746_s8, 512  ;;  %s2197_s16 = scalar_lea.hbm %s2799_s7, 1024 }
 0x473   : > { %p2194_p8 = scmp.ne.s32.totalorder %s2746_s8, %s2193_s17  ;;  %p2198_p1 = scmp.lt.u32.totalorder %s2746_s8, %s2799_s7 }
 0x474   : > { %p2199_p6 = scmp.lt.u32.totalorder %s2197_s16, %s2193_s17  ;;  %p2201_p5 = scmp.lt.u32.totalorder %s2193_s17, %s2746_s8 }
 0x475   : > { %p2195_p10 = pnand %p2194_p8, %p2857_p2 }
 0x476   : > { %p2200_p3 = por %p2199_p6, %p2198_p1 }
 0x477   : > { %p2196_p0 = pneg %p2195_p10 }
 0x478   : > { %p2202_p4 = por %p2201_p5, %p2200_p3 }
 0x47a   : > { %p2203_p11 = pnand %p2202_p4, %p2196_p0 }
 0x47c   : > { %2206 = shalt.err (!%p2203_p11)
}
 0x47d   : > { %s2269_s9 = smov 128   ;;  %s2270_s21 = smov 8  }
 0x47e   : > { %1898 = dma.vmem_to_hbm [thread:$0]  (%p2857_p2), %s2740_s1, 512, %s2746_s8, %s1469_s28, %s2269_s9, %s2269_s9, %s2270_s21  }
 0x47f PF: > { %s2858_s26 = sld [smem:[#allocation20_spill]]  ;;  %s2859_s14 = sld [smem:[#allocation22_spill]] }
 0x480   : > { %p2861_p7 = scmp.ge.s32.totalorder %s2257_s27, 2 }
 0x485   : > { %s1497_s24 = sand.u32 1, %s2858_s26   ;;  %p2860_p13 = scmp.ne.s32.totalorder %s2859_s14, 0 }
 0x486   : > { %s1498_s30 = scalar_lea.sflag [#allocation4], %s1497_s24 }
 0x487   : > { %p1924_p9 = pnand %p2861_p7, %p2860_p13 }
 0x489   : > { %2240 = dma.done.wait (!%p1924_p9), %s1498_s30, 512  }
 0x48a   : > { %2242 = vsyncadd (!%p1924_p9), %s1498_s30, 4294966784  ;;  %s2862_s27 = sld [smem:[#allocation23_spill]]  ;;  %s2863_s20 = sld [smem:[#allocation21_spill]] }
 0x48b   : > { %s2864_s26 = sld [smem:[#allocation24_spill]]  ;;  %s2865_s24 = smov %s2249_s25 }
 0x490   : > { %p25_p12 = scmp.ge.s32.totalorder %s2862_s27, 4   ;;  %s2866_s25 = smov %s2863_s20 }
 0x492   :  { %27 = sbr.rel (!%p25_p12) target bundleno = 13 (0xd), region = 134 }
 0x499   :  { %1503 = vsyncpa [#allocation3], 1 }
 0x49a   :  { %1505 = vsyncpa [#allocation3 + $0x1], 1 }
 0x49b   :  { %1506 = vsyncpa [#allocation6], 1 }
 0x49c   :  { %1508 = vsyncpa [#allocation6 + $0x1], 1 }
 0x49d   :  { %1509 = vsyncpa [#allocation9], 1 }
 0x49e   :  { %1510 = vsyncpa [#allocation12], 1 }
 0x49f   :  { %1511 = vsyncpa [#allocation4], 1 }
 0x4a0   :  { %1513 = vsyncpa [#allocation4 + $0x1], 1 }

</bundles_post_ra>
